<compile_context>
chip_gen: v7x
topology: tpu7x:2x2x1
jax: 0.10.0
libtpu: 0.0.40
codegen_flags: <defaults>
</compile_context>

<pallas_src>
import jax
import jax.numpy as jnp
import numpy as np
from jax.experimental import pallas as pl
from jax.experimental.pallas import tpu as pltpu

# ---- module hyper-parameters (defaults of LinearAttention) ----
BATCH     = 2
SEQ       = 16
DIM       = 32
DIM_COND  = 8
DIM_HEAD  = 8           # default of LinearAttention
HEADS     = 8           # default of LinearAttention
DIM_INNER = DIM_HEAD * HEADS          # 64

NORM_SCALE = DIM ** 0.5               # AdaptiveRMSNorm scale (folded into gamma slab at init)
ATTN_SCALE = DIM_HEAD ** -0.5         # TaylorSeriesLinearAttn scale (folded in-kernel)
EPS_NORM   = 1e-12                    # F.normalize eps
EPS_ATTN   = 1e-5                     # clamp(min=eps) on the denominator
C2         = 0.5 ** 0.5               # 2nd-order Taylor feature factor (reference only)


def _make_kernel(*, dim_cond, heads, dim_head, attn_scale, eps_norm, eps_attn, grided):
    """Build the kernel with all static config captured in the closure."""

    def kernel(x_ref, cond_ref, wgb_ref, wq3_ref, wkvt_ref, wo_ref, o_ref):
        nb, seq, dim = x_ref.shape
        dim_inner = heads * dim_head

        # ---- load weights once (shared across the unrolled batch loop) ----
        wgb  = wgb_ref[...]                          # (dim_cond+1, dim); sqrt(dim) pre-folded
        wq3  = wq3_ref[...] * attn_scale             # (heads, dim, dim_head); attn scale in-kernel
        wkvt = wkvt_ref[...]                         # (2*dim_inner, dim) == [Wk ; Wv]^T
        wo   = wo_ref[...]                           # (dim_inner, dim)
        ones_row = jnp.ones((1, seq), jnp.float32)   # hoisted ones row for the den fold

        cond = cond_ref[...]                         # (B or 1, dim_cond)
        if grided:
            # cond is passed whole; pick the row belonging to this grid step (v7x path).
            rows = jax.lax.broadcasted_iota(jnp.int32, (cond.shape[0], 1), 0)
            cond = jnp.sum(jnp.where(rows == pl.program_id(0), cond, 0.0),
                           axis=0, keepdims=True)    # (1, dim_cond)

        # gamma(cond) * sqrt(dim): one tiny matmul + bias row (free sublane slices of wgb)
        gamma = (jnp.dot(cond, wgb[:dim_cond, :], preferred_element_type=jnp.float32)
                 + wgb[dim_cond:dim_cond + 1, :])     # (nb, dim) [grid path: (1, dim)]

        for b in range(nb):                           # statically unrolled (nb is 1 or 2)
            x = x_ref[b]                              # (seq, dim)

            # ---- AdaptiveRMSNorm: x / max(||x||, eps) * sqrt(dim) * gamma(cond) ----
            ss  = jnp.sum(x * x, axis=-1, keepdims=True)
            inv = jax.lax.rsqrt(jnp.maximum(ss, eps_norm * eps_norm))   # EUP rsqrt
            xn  = x * inv * gamma[b:b + 1, :]                           # (seq, dim)

            # ---- fused k/v projection, produced TRANSPOSED so every head is a free
            #      sublane slice: kvt[j, i] = (xn @ Wkv)[i, j]  ->  (2*dim_inner, seq)
            kvt = jax.lax.dot_general(wkvt, xn, (((1,), (1,)), ((), ())),
                                      preferred_element_type=jnp.float32)

            o_acc = jnp.zeros((seq, dim), jnp.float32)
            for h in range(heads):
                r0 = h * dim_head
                kh = kvt[r0:r0 + dim_head, :]                              # (dh, seq) = k_h^T
                vh = kvt[dim_inner + r0:dim_inner + r0 + dim_head, :]      # (dh, seq) = v_h^T

                # q_h in natural (seq, dh) layout via its per-head weight slab (no lane slice)
                qh = jnp.dot(xn, wq3[h], preferred_element_type=jnp.float32)   # (seq, dh)

                # Taylor linear attention via the exact identity:
                #   phi(q)·phi(k) = 1 + q·k + (q·k)^2 / 2
                s = jnp.dot(qh, kh, preferred_element_type=jnp.float32)        # (seq, seq)
                w = 1.0 + s + 0.5 * (s * s)

                # [num | den] in one MXU push: den = rowsum(w) folded as a ones row of v.
                v_aug = jnp.concatenate([vh, ones_row], axis=0)                # (dh+1, seq)
                nd = jax.lax.dot_general(w, v_aug, (((1,), (1,)), ((), ())),
                                         preferred_element_type=jnp.float32)   # (seq, dh+1)
                num = nd[:, :dim_head]
                den = jnp.maximum(nd[:, dim_head:dim_head + 1], eps_attn)
                head_out = num * pl.reciprocal(den, approx=False)              # EUP reciprocal

                # accumulate output projection per head (wo head = free sublane slice)
                o_acc = o_acc + jnp.dot(head_out, wo[r0:r0 + dim_head, :],
                                        preferred_element_type=jnp.float32)    # (seq, dim)

            o_ref[b] = o_acc

    return kernel


def prepare_params(wg, bg, wq, wkv, wo, *, heads=HEADS, dim_head=DIM_HEAD):
    """One-time ('module init') re-packing of the PyTorch-style parameters.

    wg : (dim_cond, dim), bg : (1, dim), wq : (dim, dim_inner),
    wkv: (dim, 2*dim_inner), wo : (dim_inner, dim)   (all = transposed Linear.weight)
    """
    dim = wq.shape[0]
    dim_inner = heads * dim_head
    assert wq.shape == (dim, dim_inner) and wkv.shape == (dim, 2 * dim_inner)
    wgb  = jnp.concatenate([wg, bg.reshape(1, dim)], axis=0) * (dim ** 0.5)   # (dc+1, dim)
    wq3  = wq.reshape(dim, heads, dim_head).transpose(1, 0, 2)                # (heads, dim, dh)
    wkvt = wkv.T                                                              # (2*di, dim)
    return wgb, wq3, wkvt, wo


def linear_attention(x, cond, wgb, wq3, wkvt, wo):
    B, N, D = x.shape
    heads, d_w, dim_head = wq3.shape
    dim_inner = heads * dim_head
    dim_cond = wgb.shape[0] - 1
    assert d_w == D and wgb.shape == (dim_cond + 1, D)
    assert cond.shape == (B, dim_cond)
    assert wkvt.shape == (2 * dim_inner, D) and wo.shape == (dim_inner, D)

    out_shape = jax.ShapeDtypeStruct((B, N, D), jnp.float32)

    # v7x has 2 TensorCores/chip: shard the batch across them with a parallel grid.
    # On v5e/v6e (1 TC) extra grid steps only add pipeline overhead, so the whole
    # (few-KB) problem is processed in one invocation with the batch unrolled.
    device_kind = jax.devices()[0].device_kind.lower()
    use_batch_grid = B > 1 and ("v7" in device_kind or "tpu7" in device_kind)

    kernel = _make_kernel(dim_cond=dim_cond, heads=heads, dim_head=dim_head,
                          attn_scale=dim_head ** -0.5, eps_norm=EPS_NORM,
                          eps_attn=EPS_ATTN, grided=use_batch_grid)

    if use_batch_grid:
        return pl.pallas_call(
            kernel,
            out_shape=out_shape,
            grid=(B,),
            in_specs=[
                pl.BlockSpec((1, N, D), lambda b: (b, 0, 0)),      # x: one batch per core
                pl.BlockSpec((B, dim_cond), lambda b: (0, 0)),     # cond: whole (tiny)
                pl.BlockSpec(wgb.shape, lambda b: (0, 0)),
                pl.BlockSpec(wq3.shape, lambda b: (0, 0, 0)),
                pl.BlockSpec(wkvt.shape, lambda b: (0, 0)),
                pl.BlockSpec(wo.shape, lambda b: (0, 0)),
            ],
            out_specs=pl.BlockSpec((1, N, D), lambda b: (b, 0, 0)),
            compiler_params=pltpu.CompilerParams(dimension_semantics=("parallel",)),
        )(x, cond, wgb, wq3, wkvt, wo)

    vmem = pl.BlockSpec(memory_space=pltpu.MemorySpace.VMEM)
    return pl.pallas_call(
        kernel,
        out_shape=out_shape,
        in_specs=[vmem] * 6,
        out_specs=vmem,
    )(x, cond, wgb, wq3, wkvt, wo)


# ---- pure-JAX reference (mirrors the PyTorch forward 1:1, original params) ----
def reference(x, cond, wg, bg, wq, wkv, wo):
    B, N, _ = x.shape
    gamma = cond @ wg + bg[0]                                                  # (B, DIM)
    l2 = jnp.sqrt(jnp.sum(x * x, axis=-1, keepdims=True))
    xn = x / jnp.maximum(l2, EPS_NORM) * NORM_SCALE * gamma[:, None, :]
    q = jnp.einsum('bnd,de->bne', xn, wq) * ATTN_SCALE
    kvp = jnp.einsum('bnd,de->bne', xn, wkv)
    k, v = kvp[..., :DIM_INNER], kvp[..., DIM_INNER:]
    q = q.reshape(B, N, HEADS, DIM_HEAD).transpose(0, 2, 1, 3)
    k = k.reshape(B, N, HEADS, DIM_HEAD).transpose(0, 2, 1, 3)
    v = v.reshape(B, N, HEADS, DIM_HEAD).transpose(0, 2, 1, 3)

    def taylor(t):
        ones = jnp.ones(t.shape[:-1] + (1,), t.dtype)
        outer = (t[..., :, None] * t[..., None, :]).reshape(
            *t.shape[:-1], DIM_HEAD * DIM_HEAD) * C2
        return jnp.concatenate([ones, t, outer], axis=-1)

    qe, ke = taylor(q), taylor(k)
    kv_agg = jnp.einsum('bhnd,bhne->bhde', ke, v)
    den = jnp.maximum(jnp.einsum('bhnd,bhmd->bhn', qe, ke), EPS_ATTN)
    out = jnp.einsum('bhnd,bhde->bhne', qe, kv_agg) / den[..., None]
    out = out.transpose(0, 2, 1, 3).reshape(B, N, DIM_INNER)
    return out @ wo


if __name__ == "__main__":
    key = jax.random.PRNGKey(0)
    ks = jax.random.split(key, 6)
    x    = jax.random.normal(ks[0], (BATCH, SEQ, DIM), jnp.float32)
    cond = jax.random.normal(ks[1], (BATCH, DIM_COND), jnp.float32)

    # PyTorch-style parameters (stored as (in, out) = transposed torch Linear.weight).
    # to_gamma bias init = ones (per the module); weights randomized (small) so the
    # conditioning path is non-trivial.
    wg  = jax.random.normal(ks[2], (DIM_COND, DIM), jnp.float32) * 0.1
    bg  = jnp.ones((1, DIM), jnp.float32)
    wq  = jax.random.normal(ks[3], (DIM, DIM_INNER), jnp.float32) * (DIM ** -0.5)
    wkv = jax.random.normal(ks[4], (DIM, 2 * DIM_INNER), jnp.float32) * (DIM ** -0.5)
    wo  = jax.random.normal(ks[5], (DIM_INNER, DIM), jnp.float32) * (DIM_INNER ** -0.5)

    # One-time parameter re-packing (analogue of module __init__).
    wgb, wq3, wkvt, wo_p = prepare_params(wg, bg, wq, wkv, wo)

    out = linear_attention(x, cond, wgb, wq3, wkvt, wo_p)
    out = jax.block_until_ready(out)

    ref = jax.block_until_ready(reference(x, cond, wg, bg, wq, wkv, wo))
    np.testing.assert_allclose(np.asarray(out), np.asarray(ref), rtol=1e-4, atol=1e-4)

    print("KERNEL_OK")
</pallas_src>

<mosaic_0001>
module attributes {stable_mosaic.version = 11 : i64} {
  func.func @kernel(%arg0: memref<2x16x32xf32, #tpu.memory_space<vmem>>, %arg1: memref<2x8xf32, #tpu.memory_space<vmem>>, %arg2: memref<9x32xf32, #tpu.memory_space<vmem>>, %arg3: memref<8x32x8xf32, #tpu.memory_space<vmem>>, %arg4: memref<128x32xf32, #tpu.memory_space<vmem>>, %arg5: memref<64x32xf32, #tpu.memory_space<vmem>>, %arg6: memref<2x16x32xf32, #tpu.memory_space<vmem>>) attributes {dimension_semantics = [], scalar_prefetch = 0 : i64, scratch_operands = 0 : i64, tpu.core_type = #tpu.core_type<tc>} {
    %c0 = arith.constant 0 : index
    %c0_0 = arith.constant 0 : index
    %0 = vector.load %arg2[%c0, %c0_0] : memref<9x32xf32, #tpu.memory_space<vmem>>, vector<9x32xf32>
    %c0_1 = arith.constant 0 : index
    %c0_2 = arith.constant 0 : index
    %c0_3 = arith.constant 0 : index
    %1 = vector.load %arg3[%c0_1, %c0_2, %c0_3] : memref<8x32x8xf32, #tpu.memory_space<vmem>>, vector<8x32x8xf32>
    %cst = arith.constant 0.353553385 : f32
    %2 = vector.broadcast %cst : f32 to vector<8x32x8xf32>
    %3 = arith.mulf %1, %2 : vector<8x32x8xf32>
    %c0_4 = arith.constant 0 : index
    %c0_5 = arith.constant 0 : index
    %4 = vector.load %arg4[%c0_4, %c0_5] : memref<128x32xf32, #tpu.memory_space<vmem>>, vector<128x32xf32>
    %c0_6 = arith.constant 0 : index
    %c0_7 = arith.constant 0 : index
    %5 = vector.load %arg5[%c0_6, %c0_7] : memref<64x32xf32, #tpu.memory_space<vmem>>, vector<64x32xf32>
    %cst_8 = arith.constant 1.000000e+00 : f32
    %6 = vector.broadcast %cst_8 : f32 to vector<1x16xf32>
    %c0_9 = arith.constant 0 : index
    %c0_10 = arith.constant 0 : index
    %7 = vector.load %arg1[%c0_9, %c0_10] : memref<2x8xf32, #tpu.memory_space<vmem>>, vector<2x8xf32>
    %8 = vector.extract_strided_slice %0 {offsets = [0, 0], sizes = [8, 32], strides = [1, 1]} : vector<9x32xf32> to vector<8x32xf32>
    %cst_11 = arith.constant dense<0.000000e+00> : vector<2x32xf32>
    %9 = tpu.matmul %7, %8, %cst_11 {dimension_numbers = #tpu.dot_dimension_numbers<[1], [0], [0], [1], [0, 0, 1, 1], [], []>} : vector<2x8xf32>, vector<8x32xf32>, vector<2x32xf32> -> vector<2x32xf32>
    %10 = vector.extract_strided_slice %0 {offsets = [8, 0], sizes = [1, 32], strides = [1, 1]} : vector<9x32xf32> to vector<1x32xf32>
    %11 = vector.broadcast %10 : vector<1x32xf32> to vector<2x32xf32>
    %12 = arith.addf %9, %11 : vector<2x32xf32>
    %c0_12 = arith.constant 0 : index
    %c0_13 = arith.constant 0 : index
    %c0_14 = arith.constant 0 : index
    %13 = vector.load %arg0[%c0_12, %c0_13, %c0_14] : memref<2x16x32xf32, #tpu.memory_space<vmem>>, vector<1x16x32xf32>
    %14 = vector.shape_cast %13 : vector<1x16x32xf32> to vector<16x32xf32>
    %15 = arith.mulf %14, %14 : vector<16x32xf32>
    %cst_15 = arith.constant dense<0.000000e+00> : vector<16xf32>
    %16 = vector.multi_reduction <add>, %15, %cst_15 [1] : vector<16x32xf32> to vector<16xf32>
    %17 = vector.shape_cast %16 : vector<16xf32> to vector<16x1xf32>
    %cst_16 = arith.constant 1.000000e-24 : f32
    %18 = vector.broadcast %cst_16 : f32 to vector<16x1xf32>
    %19 = arith.maximumf %17, %18 : vector<16x1xf32>
    %20 = math.rsqrt %19 : vector<16x1xf32>
    %21 = vector.broadcast %20 : vector<16x1xf32> to vector<16x32xf32>
    %22 = arith.mulf %14, %21 : vector<16x32xf32>
    %23 = vector.extract_strided_slice %12 {offsets = [0, 0], sizes = [1, 32], strides = [1, 1]} : vector<2x32xf32> to vector<1x32xf32>
    %24 = vector.broadcast %23 : vector<1x32xf32> to vector<16x32xf32>
    %25 = arith.mulf %22, %24 : vector<16x32xf32>
    %cst_17 = arith.constant dense<0.000000e+00> : vector<128x16xf32>
    %26 = tpu.matmul %4, %25, %cst_17 {dimension_numbers = #tpu.dot_dimension_numbers<[1], [1], [0], [0], [0, 0, 1, 0], [], []>} : vector<128x32xf32>, vector<16x32xf32>, vector<128x16xf32> -> vector<128x16xf32>
    %cst_18 = arith.constant 0.000000e+00 : f32
    %27 = vector.broadcast %cst_18 : f32 to vector<16x32xf32>
    %28 = vector.extract_strided_slice %26 {offsets = [0, 0], sizes = [8, 16], strides = [1, 1]} : vector<128x16xf32> to vector<8x16xf32>
    %29 = vector.extract_strided_slice %26 {offsets = [64, 0], sizes = [8, 16], strides = [1, 1]} : vector<128x16xf32> to vector<8x16xf32>
    %30 = vector.extract_strided_slice %3 {offsets = [0, 0, 0], sizes = [1, 32, 8], strides = [1, 1, 1]} : vector<8x32x8xf32> to vector<1x32x8xf32>
    %31 = vector.shape_cast %30 : vector<1x32x8xf32> to vector<32x8xf32>
    %cst_19 = arith.constant dense<0.000000e+00> : vector<16x8xf32>
    %32 = tpu.matmul %25, %31, %cst_19 {dimension_numbers = #tpu.dot_dimension_numbers<[1], [0], [0], [1], [0, 0, 1, 1], [], []>} : vector<16x32xf32>, vector<32x8xf32>, vector<16x8xf32> -> vector<16x8xf32>
    %cst_20 = arith.constant dense<0.000000e+00> : vector<16x16xf32>
    %33 = tpu.matmul %32, %28, %cst_20 {dimension_numbers = #tpu.dot_dimension_numbers<[1], [0], [0], [1], [0, 0, 1, 1], [], []>} : vector<16x8xf32>, vector<8x16xf32>, vector<16x16xf32> -> vector<16x16xf32>
    %cst_21 = arith.constant 1.000000e+00 : f32
    %34 = vector.broadcast %cst_21 : f32 to vector<16x16xf32>
    %35 = arith.addf %34, %33 : vector<16x16xf32>
    %36 = arith.mulf %33, %33 : vector<16x16xf32>
    %cst_22 = arith.constant 5.000000e-01 : f32
    %37 = vector.broadcast %cst_22 : f32 to vector<16x16xf32>
    %38 = arith.mulf %37, %36 : vector<16x16xf32>
    %39 = arith.addf %35, %38 : vector<16x16xf32>
    %40 = tpu.concatenate %29, %6 in 0 : vector<8x16xf32>, vector<1x16xf32> -> vector<9x16xf32>
    %cst_23 = arith.constant dense<0.000000e+00> : vector<16x9xf32>
    %41 = tpu.matmul %39, %40, %cst_23 {dimension_numbers = #tpu.dot_dimension_numbers<[1], [1], [0], [0], [0, 0, 1, 0], [], []>} : vector<16x16xf32>, vector<9x16xf32>, vector<16x9xf32> -> vector<16x9xf32>
    %42 = vector.extract_strided_slice %41 {offsets = [0, 0], sizes = [16, 8], strides = [1, 1]} : vector<16x9xf32> to vector<16x8xf32>
    %43 = vector.extract_strided_slice %41 {offsets = [0, 8], sizes = [16, 1], strides = [1, 1]} : vector<16x9xf32> to vector<16x1xf32>
    %cst_24 = arith.constant 9.99999974E-6 : f32
    %44 = vector.broadcast %cst_24 : f32 to vector<16x1xf32>
    %45 = arith.maximumf %43, %44 : vector<16x1xf32>
    %46 = tpu.reciprocal %45 : vector<16x1xf32> -> vector<16x1xf32>
    %47 = vector.broadcast %46 : vector<16x1xf32> to vector<16x8xf32>
    %48 = arith.mulf %42, %47 : vector<16x8xf32>
    %49 = vector.extract_strided_slice %5 {offsets = [0, 0], sizes = [8, 32], strides = [1, 1]} : vector<64x32xf32> to vector<8x32xf32>
    %cst_25 = arith.constant dense<0.000000e+00> : vector<16x32xf32>
    %50 = tpu.matmul %48, %49, %cst_25 {dimension_numbers = #tpu.dot_dimension_numbers<[1], [0], [0], [1], [0, 0, 1, 1], [], []>} : vector<16x8xf32>, vector<8x32xf32>, vector<16x32xf32> -> vector<16x32xf32>
    %51 = arith.addf %27, %50 : vector<16x32xf32>
    %52 = vector.extract_strided_slice %26 {offsets = [8, 0], sizes = [8, 16], strides = [1, 1]} : vector<128x16xf32> to vector<8x16xf32>
    %53 = vector.extract_strided_slice %26 {offsets = [72, 0], sizes = [8, 16], strides = [1, 1]} : vector<128x16xf32> to vector<8x16xf32>
    %54 = vector.extract_strided_slice %3 {offsets = [1, 0, 0], sizes = [1, 32, 8], strides = [1, 1, 1]} : vector<8x32x8xf32> to vector<1x32x8xf32>
    %55 = vector.shape_cast %54 : vector<1x32x8xf32> to vector<32x8xf32>
    %cst_26 = arith.constant dense<0.000000e+00> : vector<16x8xf32>
    %56 = tpu.matmul %25, %55, %cst_26 {dimension_numbers = #tpu.dot_dimension_numbers<[1], [0], [0], [1], [0, 0, 1, 1], [], []>} : vector<16x32xf32>, vector<32x8xf32>, vector<16x8xf32> -> vector<16x8xf32>
    %cst_27 = arith.constant dense<0.000000e+00> : vector<16x16xf32>
    %57 = tpu.matmul %56, %52, %cst_27 {dimension_numbers = #tpu.dot_dimension_numbers<[1], [0], [0], [1], [0, 0, 1, 1], [], []>} : vector<16x8xf32>, vector<8x16xf32>, vector<16x16xf32> -> vector<16x16xf32>
    %cst_28 = arith.constant 1.000000e+00 : f32
    %58 = vector.broadcast %cst_28 : f32 to vector<16x16xf32>
    %59 = arith.addf %58, %57 : vector<16x16xf32>
    %60 = arith.mulf %57, %57 : vector<16x16xf32>
    %cst_29 = arith.constant 5.000000e-01 : f32
    %61 = vector.broadcast %cst_29 : f32 to vector<16x16xf32>
    %62 = arith.mulf %61, %60 : vector<16x16xf32>
    %63 = arith.addf %59, %62 : vector<16x16xf32>
    %64 = tpu.concatenate %53, %6 in 0 : vector<8x16xf32>, vector<1x16xf32> -> vector<9x16xf32>
    %cst_30 = arith.constant dense<0.000000e+00> : vector<16x9xf32>
    %65 = tpu.matmul %63, %64, %cst_30 {dimension_numbers = #tpu.dot_dimension_numbers<[1], [1], [0], [0], [0, 0, 1, 0], [], []>} : vector<16x16xf32>, vector<9x16xf32>, vector<16x9xf32> -> vector<16x9xf32>
    %66 = vector.extract_strided_slice %65 {offsets = [0, 0], sizes = [16, 8], strides = [1, 1]} : vector<16x9xf32> to vector<16x8xf32>
    %67 = vector.extract_strided_slice %65 {offsets = [0, 8], sizes = [16, 1], strides = [1, 1]} : vector<16x9xf32> to vector<16x1xf32>
    %cst_31 = arith.constant 9.99999974E-6 : f32
    %68 = vector.broadcast %cst_31 : f32 to vector<16x1xf32>
    %69 = arith.maximumf %67, %68 : vector<16x1xf32>
    %70 = tpu.reciprocal %69 : vector<16x1xf32> -> vector<16x1xf32>
    %71 = vector.broadcast %70 : vector<16x1xf32> to vector<16x8xf32>
    %72 = arith.mulf %66, %71 : vector<16x8xf32>
    %73 = vector.extract_strided_slice %5 {offsets = [8, 0], sizes = [8, 32], strides = [1, 1]} : vector<64x32xf32> to vector<8x32xf32>
    %cst_32 = arith.constant dense<0.000000e+00> : vector<16x32xf32>
    %74 = tpu.matmul %72, %73, %cst_32 {dimension_numbers = #tpu.dot_dimension_numbers<[1], [0], [0], [1], [0, 0, 1, 1], [], []>} : vector<16x8xf32>, vector<8x32xf32>, vector<16x32xf32> -> vector<16x32xf32>
    %75 = arith.addf %51, %74 : vector<16x32xf32>
    %76 = vector.extract_strided_slice %26 {offsets = [16, 0], sizes = [8, 16], strides = [1, 1]} : vector<128x16xf32> to vector<8x16xf32>
    %77 = vector.extract_strided_slice %26 {offsets = [80, 0], sizes = [8, 16], strides = [1, 1]} : vector<128x16xf32> to vector<8x16xf32>
    %78 = vector.extract_strided_slice %3 {offsets = [2, 0, 0], sizes = [1, 32, 8], strides = [1, 1, 1]} : vector<8x32x8xf32> to vector<1x32x8xf32>
    %79 = vector.shape_cast %78 : vector<1x32x8xf32> to vector<32x8xf32>
    %cst_33 = arith.constant dense<0.000000e+00> : vector<16x8xf32>
    %80 = tpu.matmul %25, %79, %cst_33 {dimension_numbers = #tpu.dot_dimension_numbers<[1], [0], [0], [1], [0, 0, 1, 1], [], []>} : vector<16x32xf32>, vector<32x8xf32>, vector<16x8xf32> -> vector<16x8xf32>
    %cst_34 = arith.constant dense<0.000000e+00> : vector<16x16xf32>
    %81 = tpu.matmul %80, %76, %cst_34 {dimension_numbers = #tpu.dot_dimension_numbers<[1], [0], [0], [1], [0, 0, 1, 1], [], []>} : vector<16x8xf32>, vector<8x16xf32>, vector<16x16xf32> -> vector<16x16xf32>
    %cst_35 = arith.constant 1.000000e+00 : f32
    %82 = vector.broadcast %cst_35 : f32 to vector<16x16xf32>
    %83 = arith.addf %82, %81 : vector<16x16xf32>
    %84 = arith.mulf %81, %81 : vector<16x16xf32>
    %cst_36 = arith.constant 5.000000e-01 : f32
    %85 = vector.broadcast %cst_36 : f32 to vector<16x16xf32>
    %86 = arith.mulf %85, %84 : vector<16x16xf32>
    %87 = arith.addf %83, %86 : vector<16x16xf32>
    %88 = tpu.concatenate %77, %6 in 0 : vector<8x16xf32>, vector<1x16xf32> -> vector<9x16xf32>
    %cst_37 = arith.constant dense<0.000000e+00> : vector<16x9xf32>
    %89 = tpu.matmul %87, %88, %cst_37 {dimension_numbers = #tpu.dot_dimension_numbers<[1], [1], [0], [0], [0, 0, 1, 0], [], []>} : vector<16x16xf32>, vector<9x16xf32>, vector<16x9xf32> -> vector<16x9xf32>
    %90 = vector.extract_strided_slice %89 {offsets = [0, 0], sizes = [16, 8], strides = [1, 1]} : vector<16x9xf32> to vector<16x8xf32>
    %91 = vector.extract_strided_slice %89 {offsets = [0, 8], sizes = [16, 1], strides = [1, 1]} : vector<16x9xf32> to vector<16x1xf32>
    %cst_38 = arith.constant 9.99999974E-6 : f32
    %92 = vector.broadcast %cst_38 : f32 to vector<16x1xf32>
    %93 = arith.maximumf %91, %92 : vector<16x1xf32>
    %94 = tpu.reciprocal %93 : vector<16x1xf32> -> vector<16x1xf32>
    %95 = vector.broadcast %94 : vector<16x1xf32> to vector<16x8xf32>
    %96 = arith.mulf %90, %95 : vector<16x8xf32>
    %97 = vector.extract_strided_slice %5 {offsets = [16, 0], sizes = [8, 32], strides = [1, 1]} : vector<64x32xf32> to vector<8x32xf32>
    %cst_39 = arith.constant dense<0.000000e+00> : vector<16x32xf32>
    %98 = tpu.matmul %96, %97, %cst_39 {dimension_numbers = #tpu.dot_dimension_numbers<[1], [0], [0], [1], [0, 0, 1, 1], [], []>} : vector<16x8xf32>, vector<8x32xf32>, vector<16x32xf32> -> vector<16x32xf32>
    %99 = arith.addf %75, %98 : vector<16x32xf32>
    %100 = vector.extract_strided_slice %26 {offsets = [24, 0], sizes = [8, 16], strides = [1, 1]} : vector<128x16xf32> to vector<8x16xf32>
    %101 = vector.extract_strided_slice %26 {offsets = [88, 0], sizes = [8, 16], strides = [1, 1]} : vector<128x16xf32> to vector<8x16xf32>
    %102 = vector.extract_strided_slice %3 {offsets = [3, 0, 0], sizes = [1, 32, 8], strides = [1, 1, 1]} : vector<8x32x8xf32> to vector<1x32x8xf32>
    %103 = vector.shape_cast %102 : vector<1x32x8xf32> to vector<32x8xf32>
    %cst_40 = arith.constant dense<0.000000e+00> : vector<16x8xf32>
    %104 = tpu.matmul %25, %103, %cst_40 {dimension_numbers = #tpu.dot_dimension_numbers<[1], [0], [0], [1], [0, 0, 1, 1], [], []>} : vector<16x32xf32>, vector<32x8xf32>, vector<16x8xf32> -> vector<16x8xf32>
    %cst_41 = arith.constant dense<0.000000e+00> : vector<16x16xf32>
    %105 = tpu.matmul %104, %100, %cst_41 {dimension_numbers = #tpu.dot_dimension_numbers<[1], [0], [0], [1], [0, 0, 1, 1], [], []>} : vector<16x8xf32>, vector<8x16xf32>, vector<16x16xf32> -> vector<16x16xf32>
    %cst_42 = arith.constant 1.000000e+00 : f32
    %106 = vector.broadcast %cst_42 : f32 to vector<16x16xf32>
    %107 = arith.addf %106, %105 : vector<16x16xf32>
    %108 = arith.mulf %105, %105 : vector<16x16xf32>
    %cst_43 = arith.constant 5.000000e-01 : f32
    %109 = vector.broadcast %cst_43 : f32 to vector<16x16xf32>
    %110 = arith.mulf %109, %108 : vector<16x16xf32>
    %111 = arith.addf %107, %110 : vector<16x16xf32>
    %112 = tpu.concatenate %101, %6 in 0 : vector<8x16xf32>, vector<1x16xf32> -> vector<9x16xf32>
    %cst_44 = arith.constant dense<0.000000e+00> : vector<16x9xf32>
    %113 = tpu.matmul %111, %112, %cst_44 {dimension_numbers = #tpu.dot_dimension_numbers<[1], [1], [0], [0], [0, 0, 1, 0], [], []>} : vector<16x16xf32>, vector<9x16xf32>, vector<16x9xf32> -> vector<16x9xf32>
    %114 = vector.extract_strided_slice %113 {offsets = [0, 0], sizes = [16, 8], strides = [1, 1]} : vector<16x9xf32> to vector<16x8xf32>
    %115 = vector.extract_strided_slice %113 {offsets = [0, 8], sizes = [16, 1], strides = [1, 1]} : vector<16x9xf32> to vector<16x1xf32>
    %cst_45 = arith.constant 9.99999974E-6 : f32
    %116 = vector.broadcast %cst_45 : f32 to vector<16x1xf32>
    %117 = arith.maximumf %115, %116 : vector<16x1xf32>
    %118 = tpu.reciprocal %117 : vector<16x1xf32> -> vector<16x1xf32>
    %119 = vector.broadcast %118 : vector<16x1xf32> to vector<16x8xf32>
    %120 = arith.mulf %114, %119 : vector<16x8xf32>
    %121 = vector.extract_strided_slice %5 {offsets = [24, 0], sizes = [8, 32], strides = [1, 1]} : vector<64x32xf32> to vector<8x32xf32>
    %cst_46 = arith.constant dense<0.000000e+00> : vector<16x32xf32>
    %122 = tpu.matmul %120, %121, %cst_46 {dimension_numbers = #tpu.dot_dimension_numbers<[1], [0], [0], [1], [0, 0, 1, 1], [], []>} : vector<16x8xf32>, vector<8x32xf32>, vector<16x32xf32> -> vector<16x32xf32>
    %123 = arith.addf %99, %122 : vector<16x32xf32>
    %124 = vector.extract_strided_slice %26 {offsets = [32, 0], sizes = [8, 16], strides = [1, 1]} : vector<128x16xf32> to vector<8x16xf32>
    %125 = vector.extract_strided_slice %26 {offsets = [96, 0], sizes = [8, 16], strides = [1, 1]} : vector<128x16xf32> to vector<8x16xf32>
    %126 = vector.extract_strided_slice %3 {offsets = [4, 0, 0], sizes = [1, 32, 8], strides = [1, 1, 1]} : vector<8x32x8xf32> to vector<1x32x8xf32>
    %127 = vector.shape_cast %126 : vector<1x32x8xf32> to vector<32x8xf32>
    %cst_47 = arith.constant dense<0.000000e+00> : vector<16x8xf32>
    %128 = tpu.matmul %25, %127, %cst_47 {dimension_numbers = #tpu.dot_dimension_numbers<[1], [0], [0], [1], [0, 0, 1, 1], [], []>} : vector<16x32xf32>, vector<32x8xf32>, vector<16x8xf32> -> vector<16x8xf32>
    %cst_48 = arith.constant dense<0.000000e+00> : vector<16x16xf32>
    %129 = tpu.matmul %128, %124, %cst_48 {dimension_numbers = #tpu.dot_dimension_numbers<[1], [0], [0], [1], [0, 0, 1, 1], [], []>} : vector<16x8xf32>, vector<8x16xf32>, vector<16x16xf32> -> vector<16x16xf32>
    %cst_49 = arith.constant 1.000000e+00 : f32
    %130 = vector.broadcast %cst_49 : f32 to vector<16x16xf32>
    %131 = arith.addf %130, %129 : vector<16x16xf32>
    %132 = arith.mulf %129, %129 : vector<16x16xf32>
    %cst_50 = arith.constant 5.000000e-01 : f32
    %133 = vector.broadcast %cst_50 : f32 to vector<16x16xf32>
    %134 = arith.mulf %133, %132 : vector<16x16xf32>
    %135 = arith.addf %131, %134 : vector<16x16xf32>
    %136 = tpu.concatenate %125, %6 in 0 : vector<8x16xf32>, vector<1x16xf32> -> vector<9x16xf32>
    %cst_51 = arith.constant dense<0.000000e+00> : vector<16x9xf32>
    %137 = tpu.matmul %135, %136, %cst_51 {dimension_numbers = #tpu.dot_dimension_numbers<[1], [1], [0], [0], [0, 0, 1, 0], [], []>} : vector<16x16xf32>, vector<9x16xf32>, vector<16x9xf32> -> vector<16x9xf32>
    %138 = vector.extract_strided_slice %137 {offsets = [0, 0], sizes = [16, 8], strides = [1, 1]} : vector<16x9xf32> to vector<16x8xf32>
    %139 = vector.extract_strided_slice %137 {offsets = [0, 8], sizes = [16, 1], strides = [1, 1]} : vector<16x9xf32> to vector<16x1xf32>
    %cst_52 = arith.constant 9.99999974E-6 : f32
    %140 = vector.broadcast %cst_52 : f32 to vector<16x1xf32>
    %141 = arith.maximumf %139, %140 : vector<16x1xf32>
    %142 = tpu.reciprocal %141 : vector<16x1xf32> -> vector<16x1xf32>
    %143 = vector.broadcast %142 : vector<16x1xf32> to vector<16x8xf32>
    %144 = arith.mulf %138, %143 : vector<16x8xf32>
    %145 = vector.extract_strided_slice %5 {offsets = [32, 0], sizes = [8, 32], strides = [1, 1]} : vector<64x32xf32> to vector<8x32xf32>
    %cst_53 = arith.constant dense<0.000000e+00> : vector<16x32xf32>
    %146 = tpu.matmul %144, %145, %cst_53 {dimension_numbers = #tpu.dot_dimension_numbers<[1], [0], [0], [1], [0, 0, 1, 1], [], []>} : vector<16x8xf32>, vector<8x32xf32>, vector<16x32xf32> -> vector<16x32xf32>
    %147 = arith.addf %123, %146 : vector<16x32xf32>
    %148 = vector.extract_strided_slice %26 {offsets = [40, 0], sizes = [8, 16], strides = [1, 1]} : vector<128x16xf32> to vector<8x16xf32>
    %149 = vector.extract_strided_slice %26 {offsets = [104, 0], sizes = [8, 16], strides = [1, 1]} : vector<128x16xf32> to vector<8x16xf32>
    %150 = vector.extract_strided_slice %3 {offsets = [5, 0, 0], sizes = [1, 32, 8], strides = [1, 1, 1]} : vector<8x32x8xf32> to vector<1x32x8xf32>
    %151 = vector.shape_cast %150 : vector<1x32x8xf32> to vector<32x8xf32>
    %cst_54 = arith.constant dense<0.000000e+00> : vector<16x8xf32>
    %152 = tpu.matmul %25, %151, %cst_54 {dimension_numbers = #tpu.dot_dimension_numbers<[1], [0], [0], [1], [0, 0, 1, 1], [], []>} : vector<16x32xf32>, vector<32x8xf32>, vector<16x8xf32> -> vector<16x8xf32>
    %cst_55 = arith.constant dense<0.000000e+00> : vector<16x16xf32>
    %153 = tpu.matmul %152, %148, %cst_55 {dimension_numbers = #tpu.dot_dimension_numbers<[1], [0], [0], [1], [0, 0, 1, 1], [], []>} : vector<16x8xf32>, vector<8x16xf32>, vector<16x16xf32> -> vector<16x16xf32>
    %cst_56 = arith.constant 1.000000e+00 : f32
    %154 = vector.broadcast %cst_56 : f32 to vector<16x16xf32>
    %155 = arith.addf %154, %153 : vector<16x16xf32>
    %156 = arith.mulf %153, %153 : vector<16x16xf32>
    %cst_57 = arith.constant 5.000000e-01 : f32
    %157 = vector.broadcast %cst_57 : f32 to vector<16x16xf32>
    %158 = arith.mulf %157, %156 : vector<16x16xf32>
    %159 = arith.addf %155, %158 : vector<16x16xf32>
    %160 = tpu.concatenate %149, %6 in 0 : vector<8x16xf32>, vector<1x16xf32> -> vector<9x16xf32>
    %cst_58 = arith.constant dense<0.000000e+00> : vector<16x9xf32>
    %161 = tpu.matmul %159, %160, %cst_58 {dimension_numbers = #tpu.dot_dimension_numbers<[1], [1], [0], [0], [0, 0, 1, 0], [], []>} : vector<16x16xf32>, vector<9x16xf32>, vector<16x9xf32> -> vector<16x9xf32>
    %162 = vector.extract_strided_slice %161 {offsets = [0, 0], sizes = [16, 8], strides = [1, 1]} : vector<16x9xf32> to vector<16x8xf32>
    %163 = vector.extract_strided_slice %161 {offsets = [0, 8], sizes = [16, 1], strides = [1, 1]} : vector<16x9xf32> to vector<16x1xf32>
    %cst_59 = arith.constant 9.99999974E-6 : f32
    %164 = vector.broadcast %cst_59 : f32 to vector<16x1xf32>
    %165 = arith.maximumf %163, %164 : vector<16x1xf32>
    %166 = tpu.reciprocal %165 : vector<16x1xf32> -> vector<16x1xf32>
    %167 = vector.broadcast %166 : vector<16x1xf32> to vector<16x8xf32>
    %168 = arith.mulf %162, %167 : vector<16x8xf32>
    %169 = vector.extract_strided_slice %5 {offsets = [40, 0], sizes = [8, 32], strides = [1, 1]} : vector<64x32xf32> to vector<8x32xf32>
    %cst_60 = arith.constant dense<0.000000e+00> : vector<16x32xf32>
    %170 = tpu.matmul %168, %169, %cst_60 {dimension_numbers = #tpu.dot_dimension_numbers<[1], [0], [0], [1], [0, 0, 1, 1], [], []>} : vector<16x8xf32>, vector<8x32xf32>, vector<16x32xf32> -> vector<16x32xf32>
    %171 = arith.addf %147, %170 : vector<16x32xf32>
    %172 = vector.extract_strided_slice %26 {offsets = [48, 0], sizes = [8, 16], strides = [1, 1]} : vector<128x16xf32> to vector<8x16xf32>
    %173 = vector.extract_strided_slice %26 {offsets = [112, 0], sizes = [8, 16], strides = [1, 1]} : vector<128x16xf32> to vector<8x16xf32>
    %174 = vector.extract_strided_slice %3 {offsets = [6, 0, 0], sizes = [1, 32, 8], strides = [1, 1, 1]} : vector<8x32x8xf32> to vector<1x32x8xf32>
    %175 = vector.shape_cast %174 : vector<1x32x8xf32> to vector<32x8xf32>
    %cst_61 = arith.constant dense<0.000000e+00> : vector<16x8xf32>
    %176 = tpu.matmul %25, %175, %cst_61 {dimension_numbers = #tpu.dot_dimension_numbers<[1], [0], [0], [1], [0, 0, 1, 1], [], []>} : vector<16x32xf32>, vector<32x8xf32>, vector<16x8xf32> -> vector<16x8xf32>
    %cst_62 = arith.constant dense<0.000000e+00> : vector<16x16xf32>
    %177 = tpu.matmul %176, %172, %cst_62 {dimension_numbers = #tpu.dot_dimension_numbers<[1], [0], [0], [1], [0, 0, 1, 1], [], []>} : vector<16x8xf32>, vector<8x16xf32>, vector<16x16xf32> -> vector<16x16xf32>
    %cst_63 = arith.constant 1.000000e+00 : f32
    %178 = vector.broadcast %cst_63 : f32 to vector<16x16xf32>
    %179 = arith.addf %178, %177 : vector<16x16xf32>
    %180 = arith.mulf %177, %177 : vector<16x16xf32>
    %cst_64 = arith.constant 5.000000e-01 : f32
    %181 = vector.broadcast %cst_64 : f32 to vector<16x16xf32>
    %182 = arith.mulf %181, %180 : vector<16x16xf32>
    %183 = arith.addf %179, %182 : vector<16x16xf32>
    %184 = tpu.concatenate %173, %6 in 0 : vector<8x16xf32>, vector<1x16xf32> -> vector<9x16xf32>
    %cst_65 = arith.constant dense<0.000000e+00> : vector<16x9xf32>
    %185 = tpu.matmul %183, %184, %cst_65 {dimension_numbers = #tpu.dot_dimension_numbers<[1], [1], [0], [0], [0, 0, 1, 0], [], []>} : vector<16x16xf32>, vector<9x16xf32>, vector<16x9xf32> -> vector<16x9xf32>
    %186 = vector.extract_strided_slice %185 {offsets = [0, 0], sizes = [16, 8], strides = [1, 1]} : vector<16x9xf32> to vector<16x8xf32>
    %187 = vector.extract_strided_slice %185 {offsets = [0, 8], sizes = [16, 1], strides = [1, 1]} : vector<16x9xf32> to vector<16x1xf32>
    %cst_66 = arith.constant 9.99999974E-6 : f32
    %188 = vector.broadcast %cst_66 : f32 to vector<16x1xf32>
    %189 = arith.maximumf %187, %188 : vector<16x1xf32>
    %190 = tpu.reciprocal %189 : vector<16x1xf32> -> vector<16x1xf32>
    %191 = vector.broadcast %190 : vector<16x1xf32> to vector<16x8xf32>
    %192 = arith.mulf %186, %191 : vector<16x8xf32>
    %193 = vector.extract_strided_slice %5 {offsets = [48, 0], sizes = [8, 32], strides = [1, 1]} : vector<64x32xf32> to vector<8x32xf32>
    %cst_67 = arith.constant dense<0.000000e+00> : vector<16x32xf32>
    %194 = tpu.matmul %192, %193, %cst_67 {dimension_numbers = #tpu.dot_dimension_numbers<[1], [0], [0], [1], [0, 0, 1, 1], [], []>} : vector<16x8xf32>, vector<8x32xf32>, vector<16x32xf32> -> vector<16x32xf32>
    %195 = arith.addf %171, %194 : vector<16x32xf32>
    %196 = vector.extract_strided_slice %26 {offsets = [56, 0], sizes = [8, 16], strides = [1, 1]} : vector<128x16xf32> to vector<8x16xf32>
    %197 = vector.extract_strided_slice %26 {offsets = [120, 0], sizes = [8, 16], strides = [1, 1]} : vector<128x16xf32> to vector<8x16xf32>
    %198 = vector.extract_strided_slice %3 {offsets = [7, 0, 0], sizes = [1, 32, 8], strides = [1, 1, 1]} : vector<8x32x8xf32> to vector<1x32x8xf32>
    %199 = vector.shape_cast %198 : vector<1x32x8xf32> to vector<32x8xf32>
    %cst_68 = arith.constant dense<0.000000e+00> : vector<16x8xf32>
    %200 = tpu.matmul %25, %199, %cst_68 {dimension_numbers = #tpu.dot_dimension_numbers<[1], [0], [0], [1], [0, 0, 1, 1], [], []>} : vector<16x32xf32>, vector<32x8xf32>, vector<16x8xf32> -> vector<16x8xf32>
    %cst_69 = arith.constant dense<0.000000e+00> : vector<16x16xf32>
    %201 = tpu.matmul %200, %196, %cst_69 {dimension_numbers = #tpu.dot_dimension_numbers<[1], [0], [0], [1], [0, 0, 1, 1], [], []>} : vector<16x8xf32>, vector<8x16xf32>, vector<16x16xf32> -> vector<16x16xf32>
    %cst_70 = arith.constant 1.000000e+00 : f32
    %202 = vector.broadcast %cst_70 : f32 to vector<16x16xf32>
    %203 = arith.addf %202, %201 : vector<16x16xf32>
    %204 = arith.mulf %201, %201 : vector<16x16xf32>
    %cst_71 = arith.constant 5.000000e-01 : f32
    %205 = vector.broadcast %cst_71 : f32 to vector<16x16xf32>
    %206 = arith.mulf %205, %204 : vector<16x16xf32>
    %207 = arith.addf %203, %206 : vector<16x16xf32>
    %208 = tpu.concatenate %197, %6 in 0 : vector<8x16xf32>, vector<1x16xf32> -> vector<9x16xf32>
    %cst_72 = arith.constant dense<0.000000e+00> : vector<16x9xf32>
    %209 = tpu.matmul %207, %208, %cst_72 {dimension_numbers = #tpu.dot_dimension_numbers<[1], [1], [0], [0], [0, 0, 1, 0], [], []>} : vector<16x16xf32>, vector<9x16xf32>, vector<16x9xf32> -> vector<16x9xf32>
    %210 = vector.extract_strided_slice %209 {offsets = [0, 0], sizes = [16, 8], strides = [1, 1]} : vector<16x9xf32> to vector<16x8xf32>
    %211 = vector.extract_strided_slice %209 {offsets = [0, 8], sizes = [16, 1], strides = [1, 1]} : vector<16x9xf32> to vector<16x1xf32>
    %cst_73 = arith.constant 9.99999974E-6 : f32
    %212 = vector.broadcast %cst_73 : f32 to vector<16x1xf32>
    %213 = arith.maximumf %211, %212 : vector<16x1xf32>
    %214 = tpu.reciprocal %213 : vector<16x1xf32> -> vector<16x1xf32>
    %215 = vector.broadcast %214 : vector<16x1xf32> to vector<16x8xf32>
    %216 = arith.mulf %210, %215 : vector<16x8xf32>
    %217 = vector.extract_strided_slice %5 {offsets = [56, 0], sizes = [8, 32], strides = [1, 1]} : vector<64x32xf32> to vector<8x32xf32>
    %cst_74 = arith.constant dense<0.000000e+00> : vector<16x32xf32>
    %218 = tpu.matmul %216, %217, %cst_74 {dimension_numbers = #tpu.dot_dimension_numbers<[1], [0], [0], [1], [0, 0, 1, 1], [], []>} : vector<16x8xf32>, vector<8x32xf32>, vector<16x32xf32> -> vector<16x32xf32>
    %219 = arith.addf %195, %218 : vector<16x32xf32>
    %c0_75 = arith.constant 0 : index
    %c0_76 = arith.constant 0 : index
    %c0_77 = arith.constant 0 : index
    %220 = vector.load %arg6[%c0_75, %c0_76, %c0_77] : memref<2x16x32xf32, #tpu.memory_space<vmem>>, vector<1x16x32xf32>
    %221 = vector.shape_cast %220 : vector<1x16x32xf32> to vector<16x32xf32>
    %222 = vector.shape_cast %219 : vector<16x32xf32> to vector<1x16x32xf32>
    tpu.vector_store %arg6[%c0_75, %c0_76, %c0_77], %222 {strides = array<i32>} : memref<2x16x32xf32, #tpu.memory_space<vmem>>, vector<1x16x32xf32>,
    %c1 = arith.constant 1 : index
    %c0_78 = arith.constant 0 : index
    %c0_79 = arith.constant 0 : index
    %223 = vector.load %arg0[%c1, %c0_78, %c0_79] : memref<2x16x32xf32, #tpu.memory_space<vmem>>, vector<1x16x32xf32>
    %224 = vector.shape_cast %223 : vector<1x16x32xf32> to vector<16x32xf32>
    %225 = arith.mulf %224, %224 : vector<16x32xf32>
    %cst_80 = arith.constant dense<0.000000e+00> : vector<16xf32>
    %226 = vector.multi_reduction <add>, %225, %cst_80 [1] : vector<16x32xf32> to vector<16xf32>
    %227 = vector.shape_cast %226 : vector<16xf32> to vector<16x1xf32>
    %cst_81 = arith.constant 1.000000e-24 : f32
    %228 = vector.broadcast %cst_81 : f32 to vector<16x1xf32>
    %229 = arith.maximumf %227, %228 : vector<16x1xf32>
    %230 = math.rsqrt %229 : vector<16x1xf32>
    %231 = vector.broadcast %230 : vector<16x1xf32> to vector<16x32xf32>
    %232 = arith.mulf %224, %231 : vector<16x32xf32>
    %233 = vector.extract_strided_slice %12 {offsets = [1, 0], sizes = [1, 32], strides = [1, 1]} : vector<2x32xf32> to vector<1x32xf32>
    %234 = vector.broadcast %233 : vector<1x32xf32> to vector<16x32xf32>
    %235 = arith.mulf %232, %234 : vector<16x32xf32>
    %cst_82 = arith.constant dense<0.000000e+00> : vector<128x16xf32>
    %236 = tpu.matmul %4, %235, %cst_82 {dimension_numbers = #tpu.dot_dimension_numbers<[1], [1], [0], [0], [0, 0, 1, 0], [], []>} : vector<128x32xf32>, vector<16x32xf32>, vector<128x16xf32> -> vector<128x16xf32>
    %cst_83 = arith.constant 0.000000e+00 : f32
    %237 = vector.broadcast %cst_83 : f32 to vector<16x32xf32>
    %238 = vector.extract_strided_slice %236 {offsets = [0, 0], sizes = [8, 16], strides = [1, 1]} : vector<128x16xf32> to vector<8x16xf32>
    %239 = vector.extract_strided_slice %236 {offsets = [64, 0], sizes = [8, 16], strides = [1, 1]} : vector<128x16xf32> to vector<8x16xf32>
    %240 = vector.extract_strided_slice %3 {offsets = [0, 0, 0], sizes = [1, 32, 8], strides = [1, 1, 1]} : vector<8x32x8xf32> to vector<1x32x8xf32>
    %241 = vector.shape_cast %240 : vector<1x32x8xf32> to vector<32x8xf32>
    %cst_84 = arith.constant dense<0.000000e+00> : vector<16x8xf32>
    %242 = tpu.matmul %235, %241, %cst_84 {dimension_numbers = #tpu.dot_dimension_numbers<[1], [0], [0], [1], [0, 0, 1, 1], [], []>} : vector<16x32xf32>, vector<32x8xf32>, vector<16x8xf32> -> vector<16x8xf32>
    %cst_85 = arith.constant dense<0.000000e+00> : vector<16x16xf32>
    %243 = tpu.matmul %242, %238, %cst_85 {dimension_numbers = #tpu.dot_dimension_numbers<[1], [0], [0], [1], [0, 0, 1, 1], [], []>} : vector<16x8xf32>, vector<8x16xf32>, vector<16x16xf32> -> vector<16x16xf32>
    %cst_86 = arith.constant 1.000000e+00 : f32
    %244 = vector.broadcast %cst_86 : f32 to vector<16x16xf32>
    %245 = arith.addf %244, %243 : vector<16x16xf32>
    %246 = arith.mulf %243, %243 : vector<16x16xf32>
    %cst_87 = arith.constant 5.000000e-01 : f32
    %247 = vector.broadcast %cst_87 : f32 to vector<16x16xf32>
    %248 = arith.mulf %247, %246 : vector<16x16xf32>
    %249 = arith.addf %245, %248 : vector<16x16xf32>
    %250 = tpu.concatenate %239, %6 in 0 : vector<8x16xf32>, vector<1x16xf32> -> vector<9x16xf32>
    %cst_88 = arith.constant dense<0.000000e+00> : vector<16x9xf32>
    %251 = tpu.matmul %249, %250, %cst_88 {dimension_numbers = #tpu.dot_dimension_numbers<[1], [1], [0], [0], [0, 0, 1, 0], [], []>} : vector<16x16xf32>, vector<9x16xf32>, vector<16x9xf32> -> vector<16x9xf32>
    %252 = vector.extract_strided_slice %251 {offsets = [0, 0], sizes = [16, 8], strides = [1, 1]} : vector<16x9xf32> to vector<16x8xf32>
    %253 = vector.extract_strided_slice %251 {offsets = [0, 8], sizes = [16, 1], strides = [1, 1]} : vector<16x9xf32> to vector<16x1xf32>
    %cst_89 = arith.constant 9.99999974E-6 : f32
    %254 = vector.broadcast %cst_89 : f32 to vector<16x1xf32>
    %255 = arith.maximumf %253, %254 : vector<16x1xf32>
    %256 = tpu.reciprocal %255 : vector<16x1xf32> -> vector<16x1xf32>
    %257 = vector.broadcast %256 : vector<16x1xf32> to vector<16x8xf32>
    %258 = arith.mulf %252, %257 : vector<16x8xf32>
    %259 = vector.extract_strided_slice %5 {offsets = [0, 0], sizes = [8, 32], strides = [1, 1]} : vector<64x32xf32> to vector<8x32xf32>
    %cst_90 = arith.constant dense<0.000000e+00> : vector<16x32xf32>
    %260 = tpu.matmul %258, %259, %cst_90 {dimension_numbers = #tpu.dot_dimension_numbers<[1], [0], [0], [1], [0, 0, 1, 1], [], []>} : vector<16x8xf32>, vector<8x32xf32>, vector<16x32xf32> -> vector<16x32xf32>
    %261 = arith.addf %237, %260 : vector<16x32xf32>
    %262 = vector.extract_strided_slice %236 {offsets = [8, 0], sizes = [8, 16], strides = [1, 1]} : vector<128x16xf32> to vector<8x16xf32>
    %263 = vector.extract_strided_slice %236 {offsets = [72, 0], sizes = [8, 16], strides = [1, 1]} : vector<128x16xf32> to vector<8x16xf32>
    %264 = vector.extract_strided_slice %3 {offsets = [1, 0, 0], sizes = [1, 32, 8], strides = [1, 1, 1]} : vector<8x32x8xf32> to vector<1x32x8xf32>
    %265 = vector.shape_cast %264 : vector<1x32x8xf32> to vector<32x8xf32>
    %cst_91 = arith.constant dense<0.000000e+00> : vector<16x8xf32>
    %266 = tpu.matmul %235, %265, %cst_91 {dimension_numbers = #tpu.dot_dimension_numbers<[1], [0], [0], [1], [0, 0, 1, 1], [], []>} : vector<16x32xf32>, vector<32x8xf32>, vector<16x8xf32> -> vector<16x8xf32>
    %cst_92 = arith.constant dense<0.000000e+00> : vector<16x16xf32>
    %267 = tpu.matmul %266, %262, %cst_92 {dimension_numbers = #tpu.dot_dimension_numbers<[1], [0], [0], [1], [0, 0, 1, 1], [], []>} : vector<16x8xf32>, vector<8x16xf32>, vector<16x16xf32> -> vector<16x16xf32>
    %cst_93 = arith.constant 1.000000e+00 : f32
    %268 = vector.broadcast %cst_93 : f32 to vector<16x16xf32>
    %269 = arith.addf %268, %267 : vector<16x16xf32>
    %270 = arith.mulf %267, %267 : vector<16x16xf32>
    %cst_94 = arith.constant 5.000000e-01 : f32
    %271 = vector.broadcast %cst_94 : f32 to vector<16x16xf32>
    %272 = arith.mulf %271, %270 : vector<16x16xf32>
    %273 = arith.addf %269, %272 : vector<16x16xf32>
    %274 = tpu.concatenate %263, %6 in 0 : vector<8x16xf32>, vector<1x16xf32> -> vector<9x16xf32>
    %cst_95 = arith.constant dense<0.000000e+00> : vector<16x9xf32>
    %275 = tpu.matmul %273, %274, %cst_95 {dimension_numbers = #tpu.dot_dimension_numbers<[1], [1], [0], [0], [0, 0, 1, 0], [], []>} : vector<16x16xf32>, vector<9x16xf32>, vector<16x9xf32> -> vector<16x9xf32>
    %276 = vector.extract_strided_slice %275 {offsets = [0, 0], sizes = [16, 8], strides = [1, 1]} : vector<16x9xf32> to vector<16x8xf32>
    %277 = vector.extract_strided_slice %275 {offsets = [0, 8], sizes = [16, 1], strides = [1, 1]} : vector<16x9xf32> to vector<16x1xf32>
    %cst_96 = arith.constant 9.99999974E-6 : f32
    %278 = vector.broadcast %cst_96 : f32 to vector<16x1xf32>
    %279 = arith.maximumf %277, %278 : vector<16x1xf32>
    %280 = tpu.reciprocal %279 : vector<16x1xf32> -> vector<16x1xf32>
    %281 = vector.broadcast %280 : vector<16x1xf32> to vector<16x8xf32>
    %282 = arith.mulf %276, %281 : vector<16x8xf32>
    %283 = vector.extract_strided_slice %5 {offsets = [8, 0], sizes = [8, 32], strides = [1, 1]} : vector<64x32xf32> to vector<8x32xf32>
    %cst_97 = arith.constant dense<0.000000e+00> : vector<16x32xf32>
    %284 = tpu.matmul %282, %283, %cst_97 {dimension_numbers = #tpu.dot_dimension_numbers<[1], [0], [0], [1], [0, 0, 1, 1], [], []>} : vector<16x8xf32>, vector<8x32xf32>, vector<16x32xf32> -> vector<16x32xf32>
    %285 = arith.addf %261, %284 : vector<16x32xf32>
    %286 = vector.extract_strided_slice %236 {offsets = [16, 0], sizes = [8, 16], strides = [1, 1]} : vector<128x16xf32> to vector<8x16xf32>
    %287 = vector.extract_strided_slice %236 {offsets = [80, 0], sizes = [8, 16], strides = [1, 1]} : vector<128x16xf32> to vector<8x16xf32>
    %288 = vector.extract_strided_slice %3 {offsets = [2, 0, 0], sizes = [1, 32, 8], strides = [1, 1, 1]} : vector<8x32x8xf32> to vector<1x32x8xf32>
    %289 = vector.shape_cast %288 : vector<1x32x8xf32> to vector<32x8xf32>
    %cst_98 = arith.constant dense<0.000000e+00> : vector<16x8xf32>
    %290 = tpu.matmul %235, %289, %cst_98 {dimension_numbers = #tpu.dot_dimension_numbers<[1], [0], [0], [1], [0, 0, 1, 1], [], []>} : vector<16x32xf32>, vector<32x8xf32>, vector<16x8xf32> -> vector<16x8xf32>
    %cst_99 = arith.constant dense<0.000000e+00> : vector<16x16xf32>
    %291 = tpu.matmul %290, %286, %cst_99 {dimension_numbers = #tpu.dot_dimension_numbers<[1], [0], [0], [1], [0, 0, 1, 1], [], []>} : vector<16x8xf32>, vector<8x16xf32>, vector<16x16xf32> -> vector<16x16xf32>
    %cst_100 = arith.constant 1.000000e+00 : f32
    %292 = vector.broadcast %cst_100 : f32 to vector<16x16xf32>
    %293 = arith.addf %292, %291 : vector<16x16xf32>
    %294 = arith.mulf %291, %291 : vector<16x16xf32>
    %cst_101 = arith.constant 5.000000e-01 : f32
    %295 = vector.broadcast %cst_101 : f32 to vector<16x16xf32>
    %296 = arith.mulf %295, %294 : vector<16x16xf32>
    %297 = arith.addf %293, %296 : vector<16x16xf32>
    %298 = tpu.concatenate %287, %6 in 0 : vector<8x16xf32>, vector<1x16xf32> -> vector<9x16xf32>
    %cst_102 = arith.constant dense<0.000000e+00> : vector<16x9xf32>
    %299 = tpu.matmul %297, %298, %cst_102 {dimension_numbers = #tpu.dot_dimension_numbers<[1], [1], [0], [0], [0, 0, 1, 0], [], []>} : vector<16x16xf32>, vector<9x16xf32>, vector<16x9xf32> -> vector<16x9xf32>
    %300 = vector.extract_strided_slice %299 {offsets = [0, 0], sizes = [16, 8], strides = [1, 1]} : vector<16x9xf32> to vector<16x8xf32>
    %301 = vector.extract_strided_slice %299 {offsets = [0, 8], sizes = [16, 1], strides = [1, 1]} : vector<16x9xf32> to vector<16x1xf32>
    %cst_103 = arith.constant 9.99999974E-6 : f32
    %302 = vector.broadcast %cst_103 : f32 to vector<16x1xf32>
    %303 = arith.maximumf %301, %302 : vector<16x1xf32>
    %304 = tpu.reciprocal %303 : vector<16x1xf32> -> vector<16x1xf32>
    %305 = vector.broadcast %304 : vector<16x1xf32> to vector<16x8xf32>
    %306 = arith.mulf %300, %305 : vector<16x8xf32>
    %307 = vector.extract_strided_slice %5 {offsets = [16, 0], sizes = [8, 32], strides = [1, 1]} : vector<64x32xf32> to vector<8x32xf32>
    %cst_104 = arith.constant dense<0.000000e+00> : vector<16x32xf32>
    %308 = tpu.matmul %306, %307, %cst_104 {dimension_numbers = #tpu.dot_dimension_numbers<[1], [0], [0], [1], [0, 0, 1, 1], [], []>} : vector<16x8xf32>, vector<8x32xf32>, vector<16x32xf32> -> vector<16x32xf32>
    %309 = arith.addf %285, %308 : vector<16x32xf32>
    %310 = vector.extract_strided_slice %236 {offsets = [24, 0], sizes = [8, 16], strides = [1, 1]} : vector<128x16xf32> to vector<8x16xf32>
    %311 = vector.extract_strided_slice %236 {offsets = [88, 0], sizes = [8, 16], strides = [1, 1]} : vector<128x16xf32> to vector<8x16xf32>
    %312 = vector.extract_strided_slice %3 {offsets = [3, 0, 0], sizes = [1, 32, 8], strides = [1, 1, 1]} : vector<8x32x8xf32> to vector<1x32x8xf32>
    %313 = vector.shape_cast %312 : vector<1x32x8xf32> to vector<32x8xf32>
    %cst_105 = arith.constant dense<0.000000e+00> : vector<16x8xf32>
    %314 = tpu.matmul %235, %313, %cst_105 {dimension_numbers = #tpu.dot_dimension_numbers<[1], [0], [0], [1], [0, 0, 1, 1], [], []>} : vector<16x32xf32>, vector<32x8xf32>, vector<16x8xf32> -> vector<16x8xf32>
    %cst_106 = arith.constant dense<0.000000e+00> : vector<16x16xf32>
    %315 = tpu.matmul %314, %310, %cst_106 {dimension_numbers = #tpu.dot_dimension_numbers<[1], [0], [0], [1], [0, 0, 1, 1], [], []>} : vector<16x8xf32>, vector<8x16xf32>, vector<16x16xf32> -> vector<16x16xf32>
    %cst_107 = arith.constant 1.000000e+00 : f32
    %316 = vector.broadcast %cst_107 : f32 to vector<16x16xf32>
    %317 = arith.addf %316, %315 : vector<16x16xf32>
    %318 = arith.mulf %315, %315 : vector<16x16xf32>
    %cst_108 = arith.constant 5.000000e-01 : f32
    %319 = vector.broadcast %cst_108 : f32 to vector<16x16xf32>
    %320 = arith.mulf %319, %318 : vector<16x16xf32>
    %321 = arith.addf %317, %320 : vector<16x16xf32>
    %322 = tpu.concatenate %311, %6 in 0 : vector<8x16xf32>, vector<1x16xf32> -> vector<9x16xf32>
    %cst_109 = arith.constant dense<0.000000e+00> : vector<16x9xf32>
    %323 = tpu.matmul %321, %322, %cst_109 {dimension_numbers = #tpu.dot_dimension_numbers<[1], [1], [0], [0], [0, 0, 1, 0], [], []>} : vector<16x16xf32>, vector<9x16xf32>, vector<16x9xf32> -> vector<16x9xf32>
    %324 = vector.extract_strided_slice %323 {offsets = [0, 0], sizes = [16, 8], strides = [1, 1]} : vector<16x9xf32> to vector<16x8xf32>
    %325 = vector.extract_strided_slice %323 {offsets = [0, 8], sizes = [16, 1], strides = [1, 1]} : vector<16x9xf32> to vector<16x1xf32>
    %cst_110 = arith.constant 9.99999974E-6 : f32
    %326 = vector.broadcast %cst_110 : f32 to vector<16x1xf32>
    %327 = arith.maximumf %325, %326 : vector<16x1xf32>
    %328 = tpu.reciprocal %327 : vector<16x1xf32> -> vector<16x1xf32>
    %329 = vector.broadcast %328 : vector<16x1xf32> to vector<16x8xf32>
    %330 = arith.mulf %324, %329 : vector<16x8xf32>
    %331 = vector.extract_strided_slice %5 {offsets = [24, 0], sizes = [8, 32], strides = [1, 1]} : vector<64x32xf32> to vector<8x32xf32>
    %cst_111 = arith.constant dense<0.000000e+00> : vector<16x32xf32>
    %332 = tpu.matmul %330, %331, %cst_111 {dimension_numbers = #tpu.dot_dimension_numbers<[1], [0], [0], [1], [0, 0, 1, 1], [], []>} : vector<16x8xf32>, vector<8x32xf32>, vector<16x32xf32> -> vector<16x32xf32>
    %333 = arith.addf %309, %332 : vector<16x32xf32>
    %334 = vector.extract_strided_slice %236 {offsets = [32, 0], sizes = [8, 16], strides = [1, 1]} : vector<128x16xf32> to vector<8x16xf32>
    %335 = vector.extract_strided_slice %236 {offsets = [96, 0], sizes = [8, 16], strides = [1, 1]} : vector<128x16xf32> to vector<8x16xf32>
    %336 = vector.extract_strided_slice %3 {offsets = [4, 0, 0], sizes = [1, 32, 8], strides = [1, 1, 1]} : vector<8x32x8xf32> to vector<1x32x8xf32>
    %337 = vector.shape_cast %336 : vector<1x32x8xf32> to vector<32x8xf32>
    %cst_112 = arith.constant dense<0.000000e+00> : vector<16x8xf32>
    %338 = tpu.matmul %235, %337, %cst_112 {dimension_numbers = #tpu.dot_dimension_numbers<[1], [0], [0], [1], [0, 0, 1, 1], [], []>} : vector<16x32xf32>, vector<32x8xf32>, vector<16x8xf32> -> vector<16x8xf32>
    %cst_113 = arith.constant dense<0.000000e+00> : vector<16x16xf32>
    %339 = tpu.matmul %338, %334, %cst_113 {dimension_numbers = #tpu.dot_dimension_numbers<[1], [0], [0], [1], [0, 0, 1, 1], [], []>} : vector<16x8xf32>, vector<8x16xf32>, vector<16x16xf32> -> vector<16x16xf32>
    %cst_114 = arith.constant 1.000000e+00 : f32
    %340 = vector.broadcast %cst_114 : f32 to vector<16x16xf32>
    %341 = arith.addf %340, %339 : vector<16x16xf32>
    %342 = arith.mulf %339, %339 : vector<16x16xf32>
    %cst_115 = arith.constant 5.000000e-01 : f32
    %343 = vector.broadcast %cst_115 : f32 to vector<16x16xf32>
    %344 = arith.mulf %343, %342 : vector<16x16xf32>
    %345 = arith.addf %341, %344 : vector<16x16xf32>
    %346 = tpu.concatenate %335, %6 in 0 : vector<8x16xf32>, vector<1x16xf32> -> vector<9x16xf32>
    %cst_116 = arith.constant dense<0.000000e+00> : vector<16x9xf32>
    %347 = tpu.matmul %345, %346, %cst_116 {dimension_numbers = #tpu.dot_dimension_numbers<[1], [1], [0], [0], [0, 0, 1, 0], [], []>} : vector<16x16xf32>, vector<9x16xf32>, vector<16x9xf32> -> vector<16x9xf32>
    %348 = vector.extract_strided_slice %347 {offsets = [0, 0], sizes = [16, 8], strides = [1, 1]} : vector<16x9xf32> to vector<16x8xf32>
    %349 = vector.extract_strided_slice %347 {offsets = [0, 8], sizes = [16, 1], strides = [1, 1]} : vector<16x9xf32> to vector<16x1xf32>
    %cst_117 = arith.constant 9.99999974E-6 : f32
    %350 = vector.broadcast %cst_117 : f32 to vector<16x1xf32>
    %351 = arith.maximumf %349, %350 : vector<16x1xf32>
    %352 = tpu.reciprocal %351 : vector<16x1xf32> -> vector<16x1xf32>
    %353 = vector.broadcast %352 : vector<16x1xf32> to vector<16x8xf32>
    %354 = arith.mulf %348, %353 : vector<16x8xf32>
    %355 = vector.extract_strided_slice %5 {offsets = [32, 0], sizes = [8, 32], strides = [1, 1]} : vector<64x32xf32> to vector<8x32xf32>
    %cst_118 = arith.constant dense<0.000000e+00> : vector<16x32xf32>
    %356 = tpu.matmul %354, %355, %cst_118 {dimension_numbers = #tpu.dot_dimension_numbers<[1], [0], [0], [1], [0, 0, 1, 1], [], []>} : vector<16x8xf32>, vector<8x32xf32>, vector<16x32xf32> -> vector<16x32xf32>
    %357 = arith.addf %333, %356 : vector<16x32xf32>
    %358 = vector.extract_strided_slice %236 {offsets = [40, 0], sizes = [8, 16], strides = [1, 1]} : vector<128x16xf32> to vector<8x16xf32>
    %359 = vector.extract_strided_slice %236 {offsets = [104, 0], sizes = [8, 16], strides = [1, 1]} : vector<128x16xf32> to vector<8x16xf32>
    %360 = vector.extract_strided_slice %3 {offsets = [5, 0, 0], sizes = [1, 32, 8], strides = [1, 1, 1]} : vector<8x32x8xf32> to vector<1x32x8xf32>
    %361 = vector.shape_cast %360 : vector<1x32x8xf32> to vector<32x8xf32>
    %cst_119 = arith.constant dense<0.000000e+00> : vector<16x8xf32>
    %362 = tpu.matmul %235, %361, %cst_119 {dimension_numbers = #tpu.dot_dimension_numbers<[1], [0], [0], [1], [0, 0, 1, 1], [], []>} : vector<16x32xf32>, vector<32x8xf32>, vector<16x8xf32> -> vector<16x8xf32>
    %cst_120 = arith.constant dense<0.000000e+00> : vector<16x16xf32>
    %363 = tpu.matmul %362, %358, %cst_120 {dimension_numbers = #tpu.dot_dimension_numbers<[1], [0], [0], [1], [0, 0, 1, 1], [], []>} : vector<16x8xf32>, vector<8x16xf32>, vector<16x16xf32> -> vector<16x16xf32>
    %cst_121 = arith.constant 1.000000e+00 : f32
    %364 = vector.broadcast %cst_121 : f32 to vector<16x16xf32>
    %365 = arith.addf %364, %363 : vector<16x16xf32>
    %366 = arith.mulf %363, %363 : vector<16x16xf32>
    %cst_122 = arith.constant 5.000000e-01 : f32
    %367 = vector.broadcast %cst_122 : f32 to vector<16x16xf32>
    %368 = arith.mulf %367, %366 : vector<16x16xf32>
    %369 = arith.addf %365, %368 : vector<16x16xf32>
    %370 = tpu.concatenate %359, %6 in 0 : vector<8x16xf32>, vector<1x16xf32> -> vector<9x16xf32>
    %cst_123 = arith.constant dense<0.000000e+00> : vector<16x9xf32>
    %371 = tpu.matmul %369, %370, %cst_123 {dimension_numbers = #tpu.dot_dimension_numbers<[1], [1], [0], [0], [0, 0, 1, 0], [], []>} : vector<16x16xf32>, vector<9x16xf32>, vector<16x9xf32> -> vector<16x9xf32>
    %372 = vector.extract_strided_slice %371 {offsets = [0, 0], sizes = [16, 8], strides = [1, 1]} : vector<16x9xf32> to vector<16x8xf32>
    %373 = vector.extract_strided_slice %371 {offsets = [0, 8], sizes = [16, 1], strides = [1, 1]} : vector<16x9xf32> to vector<16x1xf32>
    %cst_124 = arith.constant 9.99999974E-6 : f32
    %374 = vector.broadcast %cst_124 : f32 to vector<16x1xf32>
    %375 = arith.maximumf %373, %374 : vector<16x1xf32>
    %376 = tpu.reciprocal %375 : vector<16x1xf32> -> vector<16x1xf32>
    %377 = vector.broadcast %376 : vector<16x1xf32> to vector<16x8xf32>
    %378 = arith.mulf %372, %377 : vector<16x8xf32>
    %379 = vector.extract_strided_slice %5 {offsets = [40, 0], sizes = [8, 32], strides = [1, 1]} : vector<64x32xf32> to vector<8x32xf32>
    %cst_125 = arith.constant dense<0.000000e+00> : vector<16x32xf32>
    %380 = tpu.matmul %378, %379, %cst_125 {dimension_numbers = #tpu.dot_dimension_numbers<[1], [0], [0], [1], [0, 0, 1, 1], [], []>} : vector<16x8xf32>, vector<8x32xf32>, vector<16x32xf32> -> vector<16x32xf32>
    %381 = arith.addf %357, %380 : vector<16x32xf32>
    %382 = vector.extract_strided_slice %236 {offsets = [48, 0], sizes = [8, 16], strides = [1, 1]} : vector<128x16xf32> to vector<8x16xf32>
    %383 = vector.extract_strided_slice %236 {offsets = [112, 0], sizes = [8, 16], strides = [1, 1]} : vector<128x16xf32> to vector<8x16xf32>
    %384 = vector.extract_strided_slice %3 {offsets = [6, 0, 0], sizes = [1, 32, 8], strides = [1, 1, 1]} : vector<8x32x8xf32> to vector<1x32x8xf32>
    %385 = vector.shape_cast %384 : vector<1x32x8xf32> to vector<32x8xf32>
    %cst_126 = arith.constant dense<0.000000e+00> : vector<16x8xf32>
    %386 = tpu.matmul %235, %385, %cst_126 {dimension_numbers = #tpu.dot_dimension_numbers<[1], [0], [0], [1], [0, 0, 1, 1], [], []>} : vector<16x32xf32>, vector<32x8xf32>, vector<16x8xf32> -> vector<16x8xf32>
    %cst_127 = arith.constant dense<0.000000e+00> : vector<16x16xf32>
    %387 = tpu.matmul %386, %382, %cst_127 {dimension_numbers = #tpu.dot_dimension_numbers<[1], [0], [0], [1], [0, 0, 1, 1], [], []>} : vector<16x8xf32>, vector<8x16xf32>, vector<16x16xf32> -> vector<16x16xf32>
    %cst_128 = arith.constant 1.000000e+00 : f32
    %388 = vector.broadcast %cst_128 : f32 to vector<16x16xf32>
    %389 = arith.addf %388, %387 : vector<16x16xf32>
    %390 = arith.mulf %387, %387 : vector<16x16xf32>
    %cst_129 = arith.constant 5.000000e-01 : f32
    %391 = vector.broadcast %cst_129 : f32 to vector<16x16xf32>
    %392 = arith.mulf %391, %390 : vector<16x16xf32>
    %393 = arith.addf %389, %392 : vector<16x16xf32>
    %394 = tpu.concatenate %383, %6 in 0 : vector<8x16xf32>, vector<1x16xf32> -> vector<9x16xf32>
    %cst_130 = arith.constant dense<0.000000e+00> : vector<16x9xf32>
    %395 = tpu.matmul %393, %394, %cst_130 {dimension_numbers = #tpu.dot_dimension_numbers<[1], [1], [0], [0], [0, 0, 1, 0], [], []>} : vector<16x16xf32>, vector<9x16xf32>, vector<16x9xf32> -> vector<16x9xf32>
    %396 = vector.extract_strided_slice %395 {offsets = [0, 0], sizes = [16, 8], strides = [1, 1]} : vector<16x9xf32> to vector<16x8xf32>
    %397 = vector.extract_strided_slice %395 {offsets = [0, 8], sizes = [16, 1], strides = [1, 1]} : vector<16x9xf32> to vector<16x1xf32>
    %cst_131 = arith.constant 9.99999974E-6 : f32
    %398 = vector.broadcast %cst_131 : f32 to vector<16x1xf32>
    %399 = arith.maximumf %397, %398 : vector<16x1xf32>
    %400 = tpu.reciprocal %399 : vector<16x1xf32> -> vector<16x1xf32>
    %401 = vector.broadcast %400 : vector<16x1xf32> to vector<16x8xf32>
    %402 = arith.mulf %396, %401 : vector<16x8xf32>
    %403 = vector.extract_strided_slice %5 {offsets = [48, 0], sizes = [8, 32], strides = [1, 1]} : vector<64x32xf32> to vector<8x32xf32>
    %cst_132 = arith.constant dense<0.000000e+00> : vector<16x32xf32>
    %404 = tpu.matmul %402, %403, %cst_132 {dimension_numbers = #tpu.dot_dimension_numbers<[1], [0], [0], [1], [0, 0, 1, 1], [], []>} : vector<16x8xf32>, vector<8x32xf32>, vector<16x32xf32> -> vector<16x32xf32>
    %405 = arith.addf %381, %404 : vector<16x32xf32>
    %406 = vector.extract_strided_slice %236 {offsets = [56, 0], sizes = [8, 16], strides = [1, 1]} : vector<128x16xf32> to vector<8x16xf32>
    %407 = vector.extract_strided_slice %236 {offsets = [120, 0], sizes = [8, 16], strides = [1, 1]} : vector<128x16xf32> to vector<8x16xf32>
    %408 = vector.extract_strided_slice %3 {offsets = [7, 0, 0], sizes = [1, 32, 8], strides = [1, 1, 1]} : vector<8x32x8xf32> to vector<1x32x8xf32>
    %409 = vector.shape_cast %408 : vector<1x32x8xf32> to vector<32x8xf32>
    %cst_133 = arith.constant dense<0.000000e+00> : vector<16x8xf32>
    %410 = tpu.matmul %235, %409, %cst_133 {dimension_numbers = #tpu.dot_dimension_numbers<[1], [0], [0], [1], [0, 0, 1, 1], [], []>} : vector<16x32xf32>, vector<32x8xf32>, vector<16x8xf32> -> vector<16x8xf32>
    %cst_134 = arith.constant dense<0.000000e+00> : vector<16x16xf32>
    %411 = tpu.matmul %410, %406, %cst_134 {dimension_numbers = #tpu.dot_dimension_numbers<[1], [0], [0], [1], [0, 0, 1, 1], [], []>} : vector<16x8xf32>, vector<8x16xf32>, vector<16x16xf32> -> vector<16x16xf32>
    %cst_135 = arith.constant 1.000000e+00 : f32
    %412 = vector.broadcast %cst_135 : f32 to vector<16x16xf32>
    %413 = arith.addf %412, %411 : vector<16x16xf32>
    %414 = arith.mulf %411, %411 : vector<16x16xf32>
    %cst_136 = arith.constant 5.000000e-01 : f32
    %415 = vector.broadcast %cst_136 : f32 to vector<16x16xf32>
    %416 = arith.mulf %415, %414 : vector<16x16xf32>
    %417 = arith.addf %413, %416 : vector<16x16xf32>
    %418 = tpu.concatenate %407, %6 in 0 : vector<8x16xf32>, vector<1x16xf32> -> vector<9x16xf32>
    %cst_137 = arith.constant dense<0.000000e+00> : vector<16x9xf32>
    %419 = tpu.matmul %417, %418, %cst_137 {dimension_numbers = #tpu.dot_dimension_numbers<[1], [1], [0], [0], [0, 0, 1, 0], [], []>} : vector<16x16xf32>, vector<9x16xf32>, vector<16x9xf32> -> vector<16x9xf32>
    %420 = vector.extract_strided_slice %419 {offsets = [0, 0], sizes = [16, 8], strides = [1, 1]} : vector<16x9xf32> to vector<16x8xf32>
    %421 = vector.extract_strided_slice %419 {offsets = [0, 8], sizes = [16, 1], strides = [1, 1]} : vector<16x9xf32> to vector<16x1xf32>
    %cst_138 = arith.constant 9.99999974E-6 : f32
    %422 = vector.broadcast %cst_138 : f32 to vector<16x1xf32>
    %423 = arith.maximumf %421, %422 : vector<16x1xf32>
    %424 = tpu.reciprocal %423 : vector<16x1xf32> -> vector<16x1xf32>
    %425 = vector.broadcast %424 : vector<16x1xf32> to vector<16x8xf32>
    %426 = arith.mulf %420, %425 : vector<16x8xf32>
    %427 = vector.extract_strided_slice %5 {offsets = [56, 0], sizes = [8, 32], strides = [1, 1]} : vector<64x32xf32> to vector<8x32xf32>
    %cst_139 = arith.constant dense<0.000000e+00> : vector<16x32xf32>
    %428 = tpu.matmul %426, %427, %cst_139 {dimension_numbers = #tpu.dot_dimension_numbers<[1], [0], [0], [1], [0, 0, 1, 1], [], []>} : vector<16x8xf32>, vector<8x32xf32>, vector<16x32xf32> -> vector<16x32xf32>
    %429 = arith.addf %405, %428 : vector<16x32xf32>
    %c1_140 = arith.constant 1 : index
    %c0_141 = arith.constant 0 : index
    %c0_142 = arith.constant 0 : index
    %430 = vector.load %arg6[%c1_140, %c0_141, %c0_142] : memref<2x16x32xf32, #tpu.memory_space<vmem>>, vector<1x16x32xf32>
    %431 = vector.shape_cast %430 : vector<1x16x32xf32> to vector<16x32xf32>
    %432 = vector.shape_cast %429 : vector<16x32xf32> to vector<1x16x32xf32>
    tpu.vector_store %arg6[%c1_140, %c0_141, %c0_142], %432 {strides = array<i32>} : memref<2x16x32xf32, #tpu.memory_space<vmem>>, vector<1x16x32xf32>,
    return
  }
}

</mosaic_0001>

<bundles_post_ra>
// kernel: tpu_custom_call.1
= control target key start
LH: loop header
LB: loop body
LE: loop exit
PB: predicated region body
PF: predicated region fallthrough
CT: control target
= control target key end

     0   :  { %vm119_vm0 = vcmask 64512   ;;  %v7530_v2 = vmov 0.0   ;;  %vm7531_vm1 = vmmov 0   ;;  %vm197_vm2 = vcmask 261120   ;;  %s8499_s0 = inlined_call_operand.vmem [shape: f32[2,16,32], index: 0, kind: input, shape index: {}]   ;;  %s8500_s1 = inlined_call_operand.vmem [shape: f32[2,8], index: 1, kind: input, shape index: {}]   ;;  %s8501_s2 = inlined_call_operand.vmem [shape: f32[9,32], index: 2, kind: input, shape index: {}]   ;;  %s8502_s3 = inlined_call_operand.vmem [shape: f32[8,32,8], index: 3, kind: input, shape index: {}]   ;;  %s8503_s4 = inlined_call_operand.vmem [shape: f32[128,32], index: 4, kind: input, shape index: {}]   ;;  %s8504_s5 = inlined_call_operand.vmem [shape: f32[64,32], index: 5, kind: input, shape index: {}]   ;;  %s8505_s6 = inlined_call_operand.hbm [shape: f32[2,16,32], index: 6, kind: output, shape index: {}]  }
   0x1   :  { %v24_v0 = vld [vmem:[%s8501_s2] sm:$0xff]  ;;  %6652 = vmatprep.subr.mxu0 %v7530_v2  ;;  %6654 = vmatprep.mubr.msk.f32.mxu0 %vm7531_vm1, %v7530_v2  ;;  %v194_v4 = vld [vmem:[%s8499_s0 + $0x8] sm:$0xff] }
   0x2   :  { %v114_v1 = vld [vmem:[%s8500_s1] sm:$0x3] }
   0x3   :  { %v193_v3 = vld [vmem:[%s8499_s0] sm:$0xff] }
   0x4   :  { %11 = vsyncpa [#allocation3], 0  ;;  %6653 = vmatpush3.msra.mxu0 %v24_v0  ;;  %v195_v5 = vmul.f32 %v193_v3, %v193_v3  ;;  %v196_v6 = vmul.f32 %v194_v4, %v194_v4  ;;  %v26_v9 = vld [vmem:[%s8502_s3] sm:$0xff]  ;;  %v27_v10 = vld [vmem:[%s8502_s3 + $0x8] sm:$0xff]  ;;  %v210_v24 = vlaneseq  ;;  %v8506_v62 = vmov 1.0  }
   0x5   :  { %6655 = vmatmul.mubr.msk.f32.vlgmr.msra.gmra.mrb[0].mxu0 %vm119_vm0, %v114_v1  ;;  %v58_v11 = vmul.f32 0.35355338, %v26_v9  ;;  %v59_v12 = vmul.f32 0.35355338, %v27_v10  ;;  %v28_v14 = vld [vmem:[%s8502_s3 + $0x10] sm:$0xff]  ;;  %v29_v15 = vld [vmem:[%s8502_s3 + $0x18] sm:$0xff]  ;;  %vm7625_vm3 = vmpackc.low %vm197_vm2, %vm197_vm2 }
   0x6   :  { %v198_v7 = vsel %vm197_vm2, %v195_v5, 0.0  ;;  %v201_v8 = vsel %vm197_vm2, %v196_v6, 0.0  ;;  %v60_v16 = vmul.f32 0.35355338, %v28_v14  ;;  %v61_v17 = vmul.f32 0.35355338, %v29_v15 }
   0x7   :  { %199 = vadd.xlane.f32.xlu0 %v198_v7  ;;  %v7593_v13 = vpack.c.bf16 %v59_v12, %v58_v11  ;;  %v7610_v19 = vld [vmem:[%s8503_s4] sm:$0xff]  ;;  %v211_v25 = vshrl.u32 %v210_v24, 7  ;;  %v6158_v27 = vld [vmem:[%s8501_s2 + $0x8] ss:$0 sm:$0xff]  ;;  %v7647_v43 = vld [vmem:[%s8503_s4 + $0x10] sm:$0xff]  ;;  %vm579_vm4 = vcmask 130048  }
   0x8   :  { %v7603_v18 = vpack.c.bf16 %v61_v17, %v60_v16  ;;  %6661 = vmatprep.mubr.msk.f32.mxu1 %vm197_vm2, %v7610_v19  ;;  %v7642_v42 = vld [vmem:[%s8503_s4 + $0x8] sm:$0xff]  ;;  %v7656_v44 = vld [vmem:[%s8503_s4 + $0x18] sm:$0xff]  ;;  %v7661_v45 = vld [vmem:[%s8503_s4 + $0x20] sm:$0xff] }
   0x9   :  { %7168 = vmatprep.subr.bf16.mxu0 %v7593_v13  ;;  %v212_v28 = vsub.s32 0, %v211_v25  ;;  %v3212_v29 = vsub.s32 1, %v211_v25  ;;  %v7670_v46 = vld [vmem:[%s8503_s4 + $0x28] sm:$0xff]  ;;  %v7677_v47 = vld [vmem:[%s8503_s4 + $0x30] sm:$0xff]  ;;  %v7684_v48 = vld [vmem:[%s8503_s4 + $0x38] sm:$0xff] }
   0xa   :  { %7170 = vmatpush3.bf16.msra.mxu0 %v7593_v13  ;;  %v7689_v49 = vld [vmem:[%s8503_s4 + $0x40] sm:$0xff]  ;;  %v7698_v50 = vld [vmem:[%s8503_s4 + $0x48] sm:$0xff]  ;;  %vm7720_vm5 = vmpackc.low %vm579_vm4, %vm579_vm4 }
   0xb   :  { %202 = vadd.xlane.f32.xlu0 %v201_v8  ;;  %7172 = vmatprep.subr.bf16.mxu0 %v7603_v18  ;;  %v32_v9 = vld [vmem:[%s8502_s3 + $0x30] sm:$0xff]  ;;  %v33_v10 = vld [vmem:[%s8502_s3 + $0x38] sm:$0xff] }
   0xc   :  { %v64_v16 = vmul.f32 0.35355338, %v32_v9  ;;  %v65_v17 = vmul.f32 0.35355338, %v33_v10 }
   0xe   :  { %7174 = vmatpush3.bf16.msra.mxu0 %v7603_v18  ;;  %v7747_v25 = vpack.c.bf16 %v65_v17, %v64_v16  ;;  %v38_v17 = vld [vmem:[%s8502_s3 + $0x60] sm:$0xff] }
  0x94   :  { %v200_v20 = vpop.xlane.xlu0 %199 }
  0x95   :  { %v204_v23 = vmax.f32 %v200_v20, 1e-24 }
  0x98   :  { %v203_v21 = vpop.xlane.xlu0 %202 }
  0x99   :  { %v205_v22 = vmax.f32 %v203_v21, 1e-24 }
  0x9b   :  { %7434 = vrsqrt.f32 %v205_v22 }
  0x9c   :  { %7436 = vrsqrt.f32 %v204_v23 }
  0xa5   :  { %v7435_v26 = vpop.eup %7434 }
  0xa6   :  { %v7437_v30 = vpop.eup %7436  ;;  %v209_v33 = vmul.f32 %v7435_v26, %v194_v4  ;;  %v31_v4 = vld [vmem:[%s8502_s3 + $0x28] sm:$0xff]  ;;  %v7533_v26 = vmov 8  }
  0xa7   :  { %v208_v35 = vmul.f32 %v7437_v30, %v193_v3  ;;  %v30_v3 = vld [vmem:[%s8502_s3 + $0x20] sm:$0xff]  ;;  %v63_v6 = vmul.f32 0.35355338, %v31_v4  ;;  %7433 = vset.pattern.permute.xlu0 %v7533_v26  ;;  %7432 = vset.pattern.permute.xlu1 %v7533_v26  ;;  %v70_v26 = vmul.f32 0.35355338, %v38_v17 }
  0xa8   :  { %v62_v5 = vmul.f32 0.35355338, %v30_v3 }
  0xaa   :  { %v7738_v7 = vpack.c.bf16 %v63_v6, %v62_v5  ;;  %v36_v5 = vld [vmem:[%s8502_s3 + $0x50] sm:$0xff]  ;;  %v37_v6 = vld [vmem:[%s8502_s3 + $0x58] sm:$0xff] }
  0xd8   :  { %v189_v31 = vpop.f32.mrb[0].mxu0 }
  0xd9   :  { %v190_v32 = vadd.f32 %v6158_v27, %v189_v31  ;;  %v6656_v34 = vpop.f32.mrb[1].mxu0 }
  0xdb   :  { %v213_v36 = vrot.slane %v190_v32, %v212_v28  ;;  %v7617_v37 = vrot.slane %v190_v32, %v3212_v29 }
  0xdd   :  { %v7619_v38 = vmul.f32 %v213_v36, %v208_v35  ;;  %v7621_v39 = vmul.f32 %v213_v36, %v209_v33  ;;  %v7768_v33 = vld [vmem:[%s8499_s0 + $0x10] sm:$0xff] }
  0xde   :  { %v3196_v34 = vmul.f32 %v7768_v33, %v7768_v33  ;;  %v7776_v36 = vld [vmem:[%s8503_s4 + $0x50] sm:$0xff] }
  0xdf   :  { %6693 = vmatprep.mubr.msk.f32.mxu0 %vm197_vm2, %v7619_v38  ;;  %v7161_v41 = vpack.c.bf16 %v7621_v39, %v7619_v38 }
  0xe0   :  { %6694 = vmatmul.mubr.msk.f32.vlgmr.msra.gmra.mrb[2].mxu0 %vm197_vm2, %v7621_v39  ;;  %v3198_v35 = vsel %vm197_vm2, %v3196_v34, 0.0 }
  0xe1   :  { %7163 = vmatprep.subr.msk.bf16.mxu1 %vm7625_vm3, %v7161_v41 }
  0xe2   :  { %7166 = vmatpush3.bf16.xpose.msk.msra.mxu1 %vm7625_vm3, %v7161_v41  ;;  %v7781_v41 = vld [vmem:[%s8503_s4 + $0x58] sm:$0xff] }
  0xe9   :  { %6662 = vmatmul.mubr.msk.f32.vlgmr.msra.gmra.mrb[0].mxu1 %vm197_vm2, %v7642_v42 }
  0xea   :  { %6664 = vmatprep.mubr.msk.f32.mxu1 %vm197_vm2, %v7647_v43 }
  0xed   :  { %6665 = vmatmul.mubr.msk.f32.gmra.mrb[2].mxu1 %vm197_vm2, %v7656_v44 }
  0xee   :  { %6667 = vmatprep.mubr.msk.f32.mxu1 %vm197_vm2, %v7661_v45 }
  0xf1   :  { %6668 = vmatmul.mubr.msk.f32.gmra.mrb[4].mxu1 %vm197_vm2, %v7670_v46 }
  0xf2   :  { %6670 = vmatprep.mubr.msk.f32.mxu1 %vm197_vm2, %v7677_v47 }
  0xf5   :  { %6671 = vmatmul.mubr.msk.f32.gmra.mrb[6].mxu1 %vm197_vm2, %v7684_v48 }
  0xf6   :  { %6673 = vmatprep.mubr.msk.f32.mxu1 %vm197_vm2, %v7689_v49 }
  0xf9   :  { %6674 = vmatmul.mubr.msk.f32.gmra.mrb[8].mxu1 %vm197_vm2, %v7698_v50 }
  0xfa   :  { %6676 = vmatprep.mubr.msk.f32.mxu1 %vm197_vm2, %v7776_v36 }
  0xfd   :  { %6677 = vmatmul.mubr.msk.f32.gmra.mrb[10].mxu1 %vm197_vm2, %v7781_v41 }
 0x1b3   :  { %v6695_v51 = vpop.f32.mrb[2].mxu0 }
 0x1b4   :  { %v481_v52 = vpop.f32.mrb[3].mxu0 }
 0x1b5   :  { %6698 = vmatprep.mubr.msk.f32.mxu0 %vm119_vm0, %v481_v52  ;;  %v7797_v52 = vld [vmem:[%s8503_s4 + $0x68] sm:$0xff] }
 0x1bc   :  { %v6663_v53 = vpop.f32.mrb[0].mxu1 }
 0x1bd   :  { %v336_v54 = vpop.f32.mrb[1].mxu1 }
 0x1be   :  { %6696 = vmatprep.subr.mxu0 %v336_v54 }
 0x1bf   :  { %6697 = vmatpush3.msra.mxu0 %v336_v54  ;;  %v7811_v54 = vld [vmem:[%s8503_s4 + $0x78] sm:$0xff] }
 0x1c0   :  { %6699 = vmatmul.mubr.msk.f32.vlgmr.msra.gmra.mrb[4].mxu0 %vm119_vm0, %v6695_v51  ;;  %v7704_v55 = vpop.f32.mrb[2].mxu1  ;;  %v7786_v51 = vld [vmem:[%s8503_s4 + $0x60] sm:$0xff] }
 0x1c1   :  { %v7706_v56 = vpop.f32.mrb[3].mxu1  ;;  %6679 = vmatprep.mubr.msk.f32.mxu1 %vm197_vm2, %v7786_v51 }
 0x1c2   :  { %6680 = vmatmul.mubr.msk.f32.gmra.mrb[12].mxu1 %vm197_vm2, %v7797_v52 }
 0x1c4   :  { %v7708_v57 = vpop.f32.mrb[4].mxu1 }
 0x1c5   :  { %v7710_v58 = vpop.f32.mrb[5].mxu1 }
 0x1c8   :  { %v7712_v59 = vpop.f32.mrb[6].mxu1 }
 0x1c9   :  { %v7714_v60 = vpop.f32.mrb[7].mxu1 }
 0x1cc   :  { %v6675_v61 = vpop.f32.mrb[8].mxu1 }
 0x1cd   :  { %v7189_v63 = vpack.c.bf16 %v8506_v62, %v6675_v61  ;;  %v376_v0 = vpop.f32.mrb[9].mxu1  ;;  %v34_v61 = vld [vmem:[%s8502_s3 + $0x40] sm:$0xff] }
 0x1ce   :  { %v7175_v1 = vpack.c.bf16 %v8506_v62, %v376_v0  ;;  %v66_v0 = vmul.f32 0.35355338, %v34_v61  ;;  %v42_v61 = vld [vmem:[%s8502_s3 + $0x80] sm:$0xff] }
 0x1cf   :  { %7191 = vmatprep.subr.msk.bf16.mxu1 %vm7720_vm5, %v7189_v63 }
 0x1d0   :  { %7177 = vmatprep.subr.msk.bf16.mxu0 %vm7720_vm5, %v7175_v1  ;;  %7194 = vmatpush3.bf16.xpose.msk.msra.mxu1 %vm7720_vm5, %v7189_v63  ;;  %v35_v63 = vld [vmem:[%s8502_s3 + $0x48] sm:$0xff] }
 0x1d1   :  { %7180 = vmatpush3.bf16.xpose.msk.msra.mxu0 %vm7720_vm5, %v7175_v1  ;;  %v67_v1 = vmul.f32 0.35355338, %v35_v63  ;;  %v43_v63 = vld [vmem:[%s8502_s3 + $0x88] sm:$0xff] }
 0x1d2   :  { %7182 = vmatprep.subr.bf16.mxu0 %v7738_v7 }
 0x1d3   :  { %v7821_v3 = vpack.c.bf16 %v67_v1, %v66_v0  ;;  %v74_v1 = vmul.f32 0.35355338, %v42_v61 }
 0x1d5   :  { %7196 = vmatprep.subr.bf16.mxu1 %v7821_v3 }
 0x293   :  { %v6700_v8 = vpop.f32.mrb[4].mxu0 }
 0x294   :  { %v574_v11 = vmul.f32 %v6700_v8, %v6700_v8  ;;  %v562_v12 = vpop.f32.mrb[5].mxu0  ;;  %v572_v22 = vadd.f32 1.0, %v6700_v8 }
 0x295   :  { %v573_v14 = vmul.f32 %v562_v12, %v562_v12  ;;  %v571_v20 = vadd.f32 1.0, %v562_v12  ;;  %v68_v12 = vmul.f32 0.35355338, %v36_v5  ;;  %v44_v5 = vld [vmem:[%s8502_s3 + $0x90] sm:$0xff] }
 0x296   :  { %v576_v15 = vmul.f32 0.5, %v574_v11 }
 0x297   :  { %v575_v21 = vmul.f32 0.5, %v573_v14  ;;  %v69_v14 = vmul.f32 0.35355338, %v37_v6  ;;  %v45_v6 = vld [vmem:[%s8502_s3 + $0x98] sm:$0xff] }
 0x298   :  { %v578_v24 = vadd.f32 %v576_v15, %v572_v22 }
 0x299   :  { %v577_v23 = vadd.f32 %v575_v21, %v571_v20  ;;  %v39_v20 = vld [vmem:[%s8502_s3 + $0x68] sm:$0xff] }
 0x29b   :  { %6705 = vmatprep.mubr.msk.f32.mxu0 %vm579_vm4, %v577_v23 }
 0x29c   :  { %6706 = vmatmul.mubr.msk.f32.vlgmr.msra.gmra.mrb[6].mxu0 %vm579_vm4, %v578_v24  ;;  %v7836_v24 = vpack.c.bf16 %v69_v14, %v68_v12  ;;  %v7891_v12 = vpop.f32.mrb[10].mxu1 }
 0x29d   :  { %7184 = vmatpush3.bf16.msra.mxu0 %v7738_v7  ;;  %6716 = vmatprep.mubr.msk.f32.mxu0 %vm197_vm2, %v7619_v38  ;;  %v7893_v14 = vpop.f32.mrb[11].mxu1 }
 0x29e   :  { %7186 = vmatprep.subr.bf16.mxu0 %v7747_v25 }
 0x2a1   :  { %7188 = vmatpush3.bf16.msra.mxu0 %v7747_v25 }
 0x2a2   :  { %6719 = vmatprep.subr.mxu0 %v6663_v53 }
 0x2a4   :  { %6717 = vmatmul.mubr.msk.f32.vlgmr.msra.gmra.mrb[8].mxu0 %vm197_vm2, %v7621_v39 }
 0x2a5   :  { %6720 = vmatpush3.msra.mxu0 %v6663_v53  ;;  %v7804_v53 = vld [vmem:[%s8503_s4 + $0x70] sm:$0xff] }
 0x2a6   :  { %6682 = vmatprep.mubr.msk.f32.mxu1 %vm197_vm2, %v7804_v53 }
 0x2a7   :  { %6683 = vmatmul.mubr.msk.f32.gmra.mrb[14].mxu1 %vm197_vm2, %v7811_v54 }
 0x36f   :  { %v7758_v27 = vpop.f32.mrb[6].mxu0 }
 0x370   :  { %v7760_v28 = vpop.f32.mrb[7].mxu0 }
 0x371   :  { %v667_v29 = vmax.f32 %v7760_v28, 1e-05 }
 0x373   :  { %7438 = vrcp.f32 %v667_v29  ;;  %v71_v29 = vmul.f32 0.35355338, %v39_v20 }
 0x377   :  { %v6718_v30 = vpop.f32.mrb[8].mxu0 }
 0x378   :  { %v749_v31 = vpop.f32.mrb[9].mxu0 }
 0x379   :  { %6721 = vmatprep.mubr.msk.f32.mxu0 %vm119_vm0, %v749_v31  ;;  %v41_v31 = vld [vmem:[%s8502_s3 + $0x78] sm:$0xff] }
 0x37a   :  { %6722 = vmatmul.mubr.msk.f32.vlgmr.msra.gmra.mrb[10].mxu0 %vm119_vm0, %v6718_v30  ;;  %v40_v30 = vld [vmem:[%s8502_s3 + $0x70] sm:$0xff] }
 0x37b   :  { %v72_v34 = vmul.f32 0.35355338, %v40_v30 }
 0x37d   :  { %v7439_v32 = vpop.eup %7438 }
 0x37e   :  { %673 = vperm.xlu0 %7433, %v7439_v32   ;;  %v7850_v32 = vpack.c.bf16 %v71_v29, %v70_v26 }
 0x39d   :  { %3199 = vadd.xlane.f32.xlu0 %v3198_v35  ;;  %v73_v35 = vmul.f32 0.35355338, %v41_v31 }
 0x39f   :  { %v7860_v0 = vpack.c.bf16 %v73_v35, %v72_v34  ;;  %v668_v35 = vmax.f32 %v7758_v27, 1e-05 }
 0x44d   :  { %v6723_v4 = vpop.f32.mrb[10].mxu0 }
 0x44e   :  { %v842_v8 = vmul.f32 %v6723_v4, %v6723_v4  ;;  %v830_v9 = vpop.f32.mrb[11].mxu0  ;;  %v840_v21 = vadd.f32 1.0, %v6723_v4  ;;  %v75_v4 = vmul.f32 0.35355338, %v43_v63 }
 0x44f   :  { %v841_v10 = vmul.f32 %v830_v9, %v830_v9  ;;  %v839_v15 = vadd.f32 1.0, %v830_v9  ;;  %v76_v9 = vmul.f32 0.35355338, %v44_v5 }
 0x450   :  { %v844_v11 = vmul.f32 0.5, %v842_v8  ;;  %v7874_v8 = vpack.c.bf16 %v75_v4, %v74_v1 }
 0x451   :  { %v843_v16 = vmul.f32 0.5, %v841_v10  ;;  %v77_v10 = vmul.f32 0.35355338, %v45_v6  ;;  %v7920_v6 = vld [vmem:[%s8504_s5 + $0x8] sm:$0xff] }
 0x452   :  { %v846_v23 = vadd.f32 %v844_v11, %v840_v21  ;;  %v46_v21 = vld [vmem:[%s8502_s3 + $0xa0] sm:$0xff]  ;;  %6731 = vmatprep.subr.mxu0 %v7920_v6 }
 0x453   :  { %v845_v22 = vadd.f32 %v843_v16, %v839_v15  ;;  %v7878_v11 = vpack.c.bf16 %v77_v10, %v76_v9  ;;  %v7895_v15 = vpop.f32.mrb[12].mxu1  ;;  %v48_v10 = vld [vmem:[%s8502_s3 + $0xb0] sm:$0xff]  ;;  %6732 = vmatpush3.msra.mxu0 %v7920_v6 }
 0x454   :  { %v7897_v16 = vpop.f32.mrb[13].mxu1 }
 0x455   :  { %6728 = vmatprep.mubr.msk.f32.mxu1 %vm579_vm4, %v845_v22  ;;  %v7899_v17 = vpop.f32.mrb[14].mxu1  ;;  %v78_v22 = vmul.f32 0.35355338, %v46_v21  ;;  %v49_v21 = vld [vmem:[%s8502_s3 + $0xb8] sm:$0xff] }
 0x456   :  { %6729 = vmatmul.mubr.msk.f32.vlgmr.msra.gmra.mrb[16].mxu1 %vm579_vm4, %v846_v23  ;;  %v7901_v20 = vpop.f32.mrb[15].mxu1 }
 0x457   :  { %7198 = vmatpush3.bf16.msra.mxu1 %v7821_v3  ;;  %6749 = vmatprep.mubr.msk.f32.mxu1 %vm197_vm2, %v7619_v38 }
 0x458   :  { %7200 = vmatprep.subr.bf16.mxu1 %v7836_v24 }
 0x45b   :  { %7202 = vmatpush3.bf16.msra.mxu1 %v7836_v24 }
 0x45c   :  { %7210 = vmatprep.subr.bf16.mxu1 %v7850_v32 }
 0x45e   :  { %6750 = vmatmul.mubr.msk.f32.vlgmr.msra.gmra.mrb[18].mxu1 %vm197_vm2, %v7621_v39 }
 0x45f   :  { %7212 = vmatpush3.bf16.msra.mxu1 %v7850_v32  ;;  %6777 = vmatprep.mubr.msk.f32.mxu1 %vm197_vm2, %v7619_v38 }
 0x460   :  { %7214 = vmatprep.subr.bf16.mxu1 %v7860_v0 }
 0x463   :  { %7216 = vmatpush3.bf16.msra.mxu1 %v7860_v0 }
 0x464   :  { %7224 = vmatprep.subr.bf16.mxu1 %v7874_v8 }
 0x466   :  { %6778 = vmatmul.mubr.msk.f32.vlgmr.msra.gmra.mrb[20].mxu1 %vm197_vm2, %v7621_v39 }
 0x467   :  { %7226 = vmatpush3.bf16.msra.mxu1 %v7874_v8  ;;  %6805 = vmatprep.mubr.msk.f32.mxu1 %vm197_vm2, %v7619_v38 }
 0x468   :  { %7228 = vmatprep.subr.bf16.mxu1 %v7878_v11 }
 0x46b   :  { %7230 = vmatpush3.bf16.msra.mxu1 %v7878_v11 }
 0x46c   :  { %6808 = vmatprep.subr.mxu1 %v7710_v58 }
 0x46e   :  { %6806 = vmatmul.mubr.msk.f32.vlgmr.msra.gmra.mrb[22].mxu1 %vm197_vm2, %v7621_v39 }
 0x46f   :  { %6809 = vmatpush3.msra.mxu1 %v7710_v58  ;;  %v47_v58 = vld [vmem:[%s8502_s3 + $0xa8] sm:$0xff] }
 0x470   :  { %v79_v23 = vmul.f32 0.35355338, %v47_v58  ;;  %v7933_v58 = vld [vmem:[%s8504_s5] sm:$0xff] }
 0x471   :  { %6736 = vmatprep.subr.mxu0 %v7933_v58 }
 0x472   :  { %v7909_v26 = vpack.c.bf16 %v79_v23, %v78_v22  ;;  %v80_v22 = vmul.f32 0.35355338, %v48_v10  ;;  %v81_v23 = vmul.f32 0.35355338, %v49_v21  ;;  %v51_v10 = vld [vmem:[%s8502_s3 + $0xc8] sm:$0xff] }
 0x474   :  { %7238 = vmatprep.subr.bf16.mxu1 %v7909_v26 }
 0x529   :  { %v6730_v29 = vpop.f32.mrb[16].mxu1 }
 0x52a   :  { %v922_v30 = vpop.f32.mrb[17].mxu1  ;;  %v932_v34 = vmax.f32 %v6730_v29, 1e-05 }
 0x52b   :  { %v931_v31 = vmax.f32 %v922_v30, 1e-05 }
 0x52d   :  { %7440 = vrcp.f32 %v931_v31 }
 0x52e   :  { %7442 = vrcp.f32 %v932_v34 }
 0x52f   :  { %7444 = vrcp.f32 %v668_v35 }
 0x531   :  { %v6751_v61 = vpop.f32.mrb[18].mxu1 }
 0x532   :  { %v1175_v63 = vpop.f32.mrb[19].mxu1 }
 0x537   :  { %v7441_v1 = vpop.eup %7440 }
 0x538   :  { %937 = vperm.xlu1 %7432, %v7441_v1   ;;  %v7443_v9 = vpop.eup %7442  ;;  %v7936_v1 = vpack.c.bf16 %v81_v23, %v80_v22  ;;  %v83_v22 = vmul.f32 0.35355338, %v51_v10 }
 0x539   :  { %v7913_v4 = vpop.f32.mrb[20].mxu1  ;;  %v7445_v31 = vpop.eup %7444 }
 0x53a   :  { %v7915_v5 = vpop.f32.mrb[21].mxu1  ;;  %8516 = vst [vmem:[#allocation5_spill] sm:$0xff] %v7936_v1 }
 0x53c   :  { %942 = vperm.xlu1 %7432, %v7443_v9   ;;  %v50_v9 = vld [vmem:[%s8502_s3 + $0xc0] sm:$0xff] }
 0x53d   :  { %v82_v21 = vmul.f32 0.35355338, %v50_v9 }
 0x53f   :  { %v7955_v23 = vpack.c.bf16 %v83_v22, %v82_v21  ;;  %v7996_v22 = vld [vmem:[%s8504_s5 + $0x10] sm:$0xff] }
 0x540   :  { %678 = vperm.xlu1 %7432, %v7445_v31  }
 0x541   :  { %v6807_v34 = vpop.f32.mrb[22].mxu1 }
 0x542   :  { %v1869_v35 = vpop.f32.mrb[23].mxu1 }
 0x543   :  { %6810 = vmatprep.mubr.msk.f32.mxu1 %vm119_vm0, %v1869_v35  ;;  %v674_v35 = vpop.permute.xlu0 %673 }
 0x544   :  { %6811 = vmatmul.mubr.msk.f32.vlgmr.msra.gmra.mrb[24].mxu1 %vm119_vm0, %v6807_v34 }
 0x545   :  { %7240 = vmatpush3.bf16.msra.mxu1 %v7909_v26  ;;  %6833 = vmatprep.mubr.msk.f32.mxu1 %vm197_vm2, %v7619_v38 }
 0x546   :  { %7242 = vmatprep.subr.bf16.mxu1 %v7936_v1 }
 0x549   :  { %7244 = vmatpush3.bf16.msra.mxu1 %v7936_v1  ;;  %v681_v1 = vmul.f32 %v674_v35, %v7760_v28  ;;  %v52_v28 = vld [vmem:[%s8502_s3 + $0xd0] sm:$0xff] }
 0x54a   :  { %6836 = vmatprep.subr.mxu1 %v7708_v57 }
 0x54c   :  { %6834 = vmatmul.mubr.msk.f32.vlgmr.msra.gmra.mrb[26].mxu1 %vm197_vm2, %v7621_v39 }
 0x54d   :  { %6837 = vmatpush3.msra.mxu1 %v7708_v57 }
 0x54e   :  { %7252 = vmatprep.subr.bf16.mxu1 %v7955_v23 }
 0x5b7   :  { %v938_v31 = vpop.permute.xlu1 %937 }
 0x5b8   :  { %v945_v34 = vmul.f32 %v938_v31, %v922_v30  ;;  %v8517_v30 = vmov 1.0   ;;  %v54_v31 = vld [vmem:[%s8502_s3 + $0xe0] sm:$0xff] }
 0x5b9   :  { %v7203_v21 = vpack.c.bf16 %v8517_v30, %v7893_v14  ;;  %v84_v14 = vmul.f32 0.35355338, %v52_v28  ;;  %v86_v35 = vmul.f32 0.35355338, %v54_v31 }
 0x5ba   :  { %6733 = vmatprep.mubr.msk.f32.mxu0 %vm119_vm0, %v945_v34  ;;  %v55_v34 = vld [vmem:[%s8502_s3 + $0xe8] sm:$0xff] }
 0x5bb   :  { %v943_v57 = vpop.permute.xlu1 %942 }
 0x5bc   :  { %v946_v62 = vmul.f32 %v6730_v29, %v943_v57  ;;  %v87_v57 = vmul.f32 0.35355338, %v55_v34 }
 0x5be   :  { %6734 = vmatmul.mubr.msk.f32.vlgmr.msra.gmra.mrb[12].mxu0 %vm119_vm0, %v946_v62 }
 0x5bf   :  { %6737 = vmatpush3.msra.mxu0 %v7933_v58  ;;  %6738 = vmatprep.mubr.msk.f32.mxu0 %vm119_vm0, %v681_v1  ;;  %v679_v9 = vpop.permute.xlu1 %678 }
 0x5c0   :  { %6752 = vmatprep.subr.mxu0 %v7706_v56  ;;  %v682_v10 = vmul.f32 %v7758_v27, %v679_v9  ;;  %v8010_v9 = vpack.c.bf16 %v87_v57, %v86_v35  ;;  %v56_v35 = vld [vmem:[%s8502_s3 + $0xf0] sm:$0xff]  ;;  %v57_v57 = vld [vmem:[%s8502_s3 + $0xf8] sm:$0xff] }
 0x5c6   :  { %6739 = vmatmul.mubr.msk.f32.vlgmr.msra.gmra.mrb[12].mxu0 %vm119_vm0, %v682_v10 }
 0x5c7   :  { %6753 = vmatpush3.msra.mxu0 %v7706_v56  ;;  %6754 = vmatprep.mubr.msk.f32.mxu0 %vm119_vm0, %v1175_v63  ;;  %v53_v56 = vld [vmem:[%s8502_s3 + $0xd8] sm:$0xff] }
 0x5c8   :  { %7205 = vmatprep.subr.msk.bf16.mxu0 %vm7720_vm5, %v7203_v21  ;;  %v85_v29 = vmul.f32 0.35355338, %v53_v56 }
 0x5ca   :  { %6755 = vmatmul.mubr.msk.f32.vlgmr.msra.gmra.mrb[14].mxu0 %vm119_vm0, %v6751_v61  ;;  %v7985_v61 = vpack.c.bf16 %v85_v29, %v84_v14 }
 0x5cc   :  { %8518 = vst [vmem:[#allocation6_spill] sm:$0xff] %v7985_v61 }
 0x5ce   :  { %7208 = vmatpush3.bf16.xpose.msk.msra.mxu0 %vm7720_vm5, %v7203_v21 }
 0x5cf   :  { %6764 = vmatprep.subr.mxu0 %v7996_v22 }
 0x617   :  { %v7975_v62 = vpop.f32.mrb[24].mxu1 }
 0x618   :  { %v7977_v27 = vpop.f32.mrb[25].mxu1 }
 0x61f   :  { %v6835_v63 = vpop.f32.mrb[26].mxu1 }
 0x620   :  { %v2216_v1 = vpop.f32.mrb[27].mxu1 }
 0x621   :  { %6838 = vmatprep.mubr.msk.f32.mxu1 %vm119_vm0, %v2216_v1 }
 0x622   :  { %6839 = vmatmul.mubr.msk.f32.vlgmr.msra.gmra.mrb[28].mxu1 %vm119_vm0, %v6835_v63 }
 0x623   :  { %7254 = vmatpush3.bf16.msra.mxu1 %v7955_v23  ;;  %6861 = vmatprep.mubr.msk.f32.mxu1 %vm197_vm2, %v7619_v38 }
 0x624   :  { %7256 = vmatprep.subr.bf16.mxu1 %v7985_v61 }
 0x627   :  { %7258 = vmatpush3.bf16.msra.mxu1 %v7985_v61 }
 0x628   :  { %6864 = vmatprep.subr.mxu1 %v7714_v60 }
 0x62a   :  { %6862 = vmatmul.mubr.msk.f32.vlgmr.msra.gmra.mrb[30].mxu1 %vm197_vm2, %v7621_v39 }
 0x62b   :  { %6865 = vmatpush3.msra.mxu1 %v7714_v60 }
 0x62c   :  { %7266 = vmatprep.subr.bf16.mxu1 %v8010_v9 }
 0x69d   :  { %v6756_v10 = vpop.f32.mrb[14].mxu0 }
 0x69e   :  { %v1268_v21 = vmul.f32 %v6756_v10, %v6756_v10  ;;  %v1256_v28 = vpop.f32.mrb[15].mxu0  ;;  %v1266_v63 = vadd.f32 1.0, %v6756_v10  ;;  %v88_v10 = vmul.f32 0.35355338, %v56_v35 }
 0x69f   :  { %v1267_v56 = vmul.f32 %v1256_v28, %v1256_v28  ;;  %v1265_v60 = vadd.f32 1.0, %v1256_v28 }
 0x6a0   :  { %v1270_v14 = vmul.f32 0.5, %v1268_v21  ;;  %v89_v21 = vmul.f32 0.35355338, %v57_v57 }
 0x6a1   :  { %v1269_v29 = vmul.f32 0.5, %v1267_v56 }
 0x6a2   :  { %v1272_v61 = vadd.f32 %v1270_v14, %v1266_v63  ;;  %v8027_v56 = vpack.c.bf16 %v89_v21, %v88_v10 }
 0x6a3   :  { %v1271_v1 = vadd.f32 %v1269_v29, %v1265_v60 }
 0x6a5   :  { %6761 = vmatprep.mubr.msk.f32.mxu0 %vm579_vm4, %v1271_v1 }
 0x6a6   :  { %6762 = vmatmul.mubr.msk.f32.vlgmr.msra.gmra.mrb[16].mxu0 %vm579_vm4, %v1272_v61 }
 0x6a7   :  { %6765 = vmatpush3.msra.mxu0 %v7996_v22 }
 0x6a8   :  { %6780 = vmatprep.subr.mxu0 %v7704_v55 }
 0x6f5   :  { %v8017_v31 = vpop.f32.mrb[28].mxu1 }
 0x6f6   :  { %v8019_v34 = vpop.f32.mrb[29].mxu1 }
 0x6fd   :  { %v6863_v28 = vpop.f32.mrb[30].mxu1 }
 0x6fe   :  { %v2563_v61 = vpop.f32.mrb[31].mxu1 }
 0x6ff   :  { %6866 = vmatprep.mubr.msk.f32.mxu1 %vm119_vm0, %v2563_v61 }
 0x700   :  { %6867 = vmatmul.mubr.msk.f32.vlgmr.msra.gmra.mrb[32].mxu1 %vm119_vm0, %v6863_v28 }
 0x701   :  { %7268 = vmatpush3.bf16.msra.mxu1 %v8010_v9  ;;  %6889 = vmatprep.mubr.msk.f32.mxu1 %vm197_vm2, %v7619_v38 }
 0x702   :  { %7270 = vmatprep.subr.bf16.mxu1 %v8027_v56 }
 0x705   :  { %7272 = vmatpush3.bf16.msra.mxu1 %v8027_v56 }
 0x706   :  { %6892 = vmatprep.subr.mxu1 %v7712_v59 }
 0x708   :  { %6890 = vmatmul.mubr.msk.f32.vlgmr.msra.gmra.mrb[34].mxu1 %vm197_vm2, %v7621_v39 }
 0x709   :  { %6893 = vmatpush3.msra.mxu1 %v7712_v59 }
 0x779   :  { %v6763_v14 = vpop.f32.mrb[16].mxu0 }
 0x77a   :  { %v1348_v60 = vpop.f32.mrb[17].mxu0  ;;  %v1358_v63 = vmax.f32 %v6763_v14, 1e-05 }
 0x77b   :  { %v1357_v29 = vmax.f32 %v1348_v60, 1e-05 }
 0x77d   :  { %7446 = vrcp.f32 %v1357_v29  ;;  %v7217_v29 = vpack.c.bf16 %v8517_v30, %v7891_v12 }
 0x77e   :  { %7448 = vrcp.f32 %v1358_v63 }
 0x787   :  { %v7447_v1 = vpop.eup %7446 }
 0x788   :  { %1363 = vperm.xlu1 %7432, %v7447_v1   ;;  %v7449_v38 = vpop.eup %7448 }
 0x78c   :  { %1368 = vperm.xlu1 %7432, %v7449_v38  }
 0x7d3   :  { %v8040_v35 = vpop.f32.mrb[32].mxu1 }
 0x7d4   :  { %v8042_v57 = vpop.f32.mrb[33].mxu1 }
 0x7db   :  { %v6891_v10 = vpop.f32.mrb[34].mxu1 }
 0x7dc   :  { %v2910_v21 = vpop.f32.mrb[35].mxu1 }
 0x7dd   :  { %6894 = vmatprep.mubr.msk.f32.mxu1 %vm119_vm0, %v2910_v21 }
 0x7de   :  { %6895 = vmatmul.mubr.msk.f32.vlgmr.msra.gmra.mrb[36].mxu1 %vm119_vm0, %v6891_v10 }
 0x7df   :  { %6913 = vmatprep.mubr.msk.f32.mxu1 %vm197_vm2, %v7610_v19  ;;  %v8064_v19 = vld [vmem:[%s8504_s5 + $0x18] sm:$0xff] }
 0x807   :  { %v1364_v39 = vpop.permute.xlu1 %1363 }
 0x808   :  { %v1371_v59 = vmul.f32 %v1364_v39, %v1348_v60 }
 0x80a   :  { %6766 = vmatprep.mubr.msk.f32.mxu0 %vm119_vm0, %v1371_v59  ;;  %v7231_v59 = vpack.c.bf16 %v8517_v30, %v7897_v16  ;;  %v1961_v16 = vmul.f32 %v7977_v27, %v7977_v27 }
 0x80b   :  { %v1369_v28 = vpop.permute.xlu1 %1368 }
 0x80c   :  { %v1372_v61 = vmul.f32 %v6763_v14, %v1369_v28 }
 0x80e   :  { %6767 = vmatmul.mubr.msk.f32.vlgmr.msra.gmra.mrb[12].mxu0 %vm119_vm0, %v1372_v61 }
 0x80f   :  { %6781 = vmatpush3.msra.mxu0 %v7704_v55  ;;  %6782 = vmatprep.mubr.msk.f32.mxu0 %vm119_vm0, %v7915_v5 }
 0x810   :  { %7219 = vmatprep.subr.msk.bf16.mxu0 %vm7720_vm5, %v7217_v29 }
 0x812   :  { %6783 = vmatmul.mubr.msk.f32.vlgmr.msra.gmra.mrb[18].mxu0 %vm119_vm0, %v7913_v4 }
 0x816   :  { %7222 = vmatpush3.bf16.xpose.msk.msra.mxu0 %vm7720_vm5, %v7217_v29 }
 0x817   :  { %6792 = vmatprep.subr.mxu0 %v8064_v19 }
 0x8b1   :  { %v8067_v55 = vpop.f32.mrb[36].mxu1 }
 0x8b2   :  { %v8069_v12 = vpop.f32.mrb[37].mxu1 }
 0x8e5   :  { %v6784_v5 = vpop.f32.mrb[18].mxu0 }
 0x8e6   :  { %v1615_v14 = vmul.f32 %v6784_v5, %v6784_v5  ;;  %v1603_v60 = vpop.f32.mrb[19].mxu0  ;;  %v1613_v10 = vadd.f32 1.0, %v6784_v5 }
 0x8e7   :  { %v1614_v63 = vmul.f32 %v1603_v60, %v1603_v60  ;;  %v1612_v4 = vadd.f32 1.0, %v1603_v60 }
 0x8e8   :  { %v1617_v1 = vmul.f32 0.5, %v1615_v14 }
 0x8e9   :  { %v1616_v38 = vmul.f32 0.5, %v1614_v63 }
 0x8ea   :  { %v1619_v39 = vadd.f32 %v1617_v1, %v1613_v10 }
 0x8eb   :  { %v1618_v21 = vadd.f32 %v1616_v38, %v1612_v4  ;;  %v1963_v4 = vmul.f32 0.5, %v1961_v16  ;;  %v1959_v38 = vadd.f32 1.0, %v7977_v27  ;;  %v1960_v27 = vadd.f32 1.0, %v7975_v62 }
 0x8ed   :  { %6789 = vmatprep.mubr.msk.f32.mxu0 %vm579_vm4, %v1618_v21  ;;  %v1962_v21 = vmul.f32 %v7975_v62, %v7975_v62 }
 0x8ee   :  { %6790 = vmatmul.mubr.msk.f32.vlgmr.msra.gmra.mrb[20].mxu0 %vm579_vm4, %v1619_v39 }
 0x8ef   :  { %6793 = vmatpush3.msra.mxu0 %v8064_v19 }
 0x8f0   :  { %7233 = vmatprep.subr.msk.bf16.mxu0 %vm7720_vm5, %v7231_v59 }
 0x9c1   :  { %v6791_v28 = vpop.f32.mrb[20].mxu0 }
 0x9c2   :  { %v1695_v61 = vpop.f32.mrb[21].mxu0  ;;  %v1705_v14 = vmax.f32 %v6791_v28, 1e-05 }
 0x9c3   :  { %v1704_v29 = vmax.f32 %v1695_v61, 1e-05 }
 0x9c5   :  { %7450 = vrcp.f32 %v1704_v29  ;;  %v1965_v29 = vadd.f32 %v1963_v4, %v1959_v38 }
 0x9c6   :  { %7452 = vrcp.f32 %v1705_v14  ;;  %v8087_v14 = vld [vmem:[%s8504_s5 + $0x20] sm:$0xff] }
 0x9cf   :  { %v7451_v5 = vpop.eup %7450 }
 0x9d0   :  { %1710 = vperm.xlu1 %7432, %v7451_v5   ;;  %v7453_v60 = vpop.eup %7452 }
 0x9d4   :  { %1715 = vperm.xlu1 %7432, %v7453_v60  }
 0xa4f   :  { %v1711_v63 = vpop.permute.xlu1 %1710 }
 0xa50   :  { %v1718_v1 = vmul.f32 %v1711_v63, %v1695_v61  ;;  %v1964_v61 = vmul.f32 0.5, %v1962_v21  ;;  %v2306_v21 = vadd.f32 1.0, %v8019_v34 }
 0xa52   :  { %6794 = vmatprep.mubr.msk.f32.mxu0 %vm119_vm0, %v1718_v1  ;;  %v1966_v5 = vadd.f32 %v1964_v61, %v1960_v27 }
 0xa53   :  { %v1716_v10 = vpop.permute.xlu1 %1715 }
 0xa54   :  { %v1719_v39 = vmul.f32 %v6791_v28, %v1716_v10  ;;  %v7245_v28 = vpack.c.bf16 %v8517_v30, %v7895_v15  ;;  %v2308_v15 = vmul.f32 %v8019_v34, %v8019_v34  ;;  %v2307_v34 = vadd.f32 1.0, %v8017_v31 }
 0xa56   :  { %6795 = vmatmul.mubr.msk.f32.vlgmr.msra.gmra.mrb[12].mxu0 %vm119_vm0, %v1719_v39  ;;  %v2310_v10 = vmul.f32 0.5, %v2308_v15 }
 0xa57   :  { %7236 = vmatpush3.bf16.xpose.msk.msra.mxu0 %vm7720_vm5, %v7231_v59  ;;  %6817 = vmatprep.mubr.msk.f32.mxu0 %vm579_vm4, %v1965_v29  ;;  %v2309_v29 = vmul.f32 %v8017_v31, %v8017_v31 }
 0xa58   :  { %6820 = vmatprep.subr.mxu0 %v8087_v14  ;;  %v2312_v27 = vadd.f32 %v2310_v10, %v2306_v21  ;;  %v2653_v21 = vadd.f32 1.0, %v8042_v57 }
 0xa5e   :  { %6818 = vmatmul.mubr.msk.f32.vlgmr.msra.gmra.mrb[22].mxu0 %vm579_vm4, %v1966_v5  ;;  %v8110_v5 = vld [vmem:[%s8504_s5 + $0x28] sm:$0xff] }
 0xa5f   :  { %6821 = vmatpush3.msra.mxu0 %v8087_v14 }
 0xa60   :  { %7247 = vmatprep.subr.msk.bf16.mxu0 %vm7720_vm5, %v7245_v28 }
 0xb31   :  { %v6819_v60 = vpop.f32.mrb[22].mxu0 }
 0xb32   :  { %v2042_v59 = vpop.f32.mrb[23].mxu0  ;;  %v2052_v63 = vmax.f32 %v6819_v60, 1e-05 }
 0xb33   :  { %v2051_v16 = vmax.f32 %v2042_v59, 1e-05 }
 0xb35   :  { %7454 = vrcp.f32 %v2051_v16 }
 0xb36   :  { %7456 = vrcp.f32 %v2052_v63 }
 0xb3f   :  { %v7455_v1 = vpop.eup %7454 }
 0xb40   :  { %2057 = vperm.xlu1 %7432, %v7455_v1   ;;  %v7457_v62 = vpop.eup %7456 }
 0xb44   :  { %2062 = vperm.xlu1 %7432, %v7457_v62  }
 0xbbf   :  { %v2058_v4 = vpop.permute.xlu1 %2057 }
 0xbc0   :  { %v2065_v38 = vmul.f32 %v2058_v4, %v2042_v59  ;;  %v2311_v59 = vmul.f32 0.5, %v2309_v29  ;;  %v2656_v29 = vmul.f32 %v8040_v35, %v8040_v35 }
 0xbc2   :  { %6822 = vmatprep.mubr.msk.f32.mxu0 %vm119_vm0, %v2065_v38  ;;  %v2313_v16 = vadd.f32 %v2311_v59, %v2307_v34  ;;  %v8133_v59 = vld [vmem:[%s8504_s5 + $0x30] sm:$0xff]  ;;  %v2658_v34 = vmul.f32 0.5, %v2656_v29 }
 0xbc3   :  { %v2063_v39 = vpop.permute.xlu1 %2062 }
 0xbc4   :  { %v2066_v61 = vmul.f32 %v6819_v60, %v2063_v39  ;;  %v7259_v60 = vpack.c.bf16 %v8517_v30, %v7901_v20  ;;  %v2655_v20 = vmul.f32 %v8042_v57, %v8042_v57  ;;  %v2654_v57 = vadd.f32 1.0, %v8040_v35 }
 0xbc6   :  { %6823 = vmatmul.mubr.msk.f32.vlgmr.msra.gmra.mrb[12].mxu0 %vm119_vm0, %v2066_v61  ;;  %v2657_v10 = vmul.f32 0.5, %v2655_v20 }
 0xbc7   :  { %7250 = vmatpush3.bf16.xpose.msk.msra.mxu0 %vm7720_vm5, %v7245_v28  ;;  %6845 = vmatprep.mubr.msk.f32.mxu0 %vm579_vm4, %v2312_v27 }
 0xbc8   :  { %6848 = vmatprep.subr.mxu0 %v8110_v5  ;;  %v2659_v27 = vadd.f32 %v2657_v10, %v2653_v21 }
 0xbce   :  { %6846 = vmatmul.mubr.msk.f32.vlgmr.msra.gmra.mrb[24].mxu0 %vm579_vm4, %v2313_v16  ;;  %v2660_v16 = vadd.f32 %v2658_v34, %v2654_v57 }
 0xbcf   :  { %6849 = vmatpush3.msra.mxu0 %v8110_v5 }
 0xbd0   :  { %7261 = vmatprep.subr.msk.bf16.mxu0 %vm7720_vm5, %v7259_v60 }
 0xca1   :  { %v6847_v63 = vpop.f32.mrb[24].mxu0 }
 0xca2   :  { %v2389_v28 = vpop.f32.mrb[25].mxu0  ;;  %v2399_v62 = vmax.f32 %v6847_v63, 1e-05 }
 0xca3   :  { %v2398_v1 = vmax.f32 %v2389_v28, 1e-05 }
 0xca5   :  { %7458 = vrcp.f32 %v2398_v1 }
 0xca6   :  { %7460 = vrcp.f32 %v2399_v62 }
 0xcaf   :  { %v7459_v15 = vpop.eup %7458 }
 0xcb0   :  { %2404 = vperm.xlu1 %7432, %v7459_v15   ;;  %v7461_v31 = vpop.eup %7460 }
 0xcb4   :  { %2409 = vperm.xlu1 %7432, %v7461_v31  }
 0xd2f   :  { %v2405_v4 = vpop.permute.xlu1 %2404 }
 0xd30   :  { %v2412_v38 = vmul.f32 %v2405_v4, %v2389_v28  ;;  %v3002_v4 = vmul.f32 %v8069_v12, %v8069_v12 }
 0xd32   :  { %6850 = vmatprep.mubr.msk.f32.mxu0 %vm119_vm0, %v2412_v38  ;;  %v3004_v21 = vmul.f32 0.5, %v3002_v4 }
 0xd33   :  { %v2410_v39 = vpop.permute.xlu1 %2409 }
 0xd34   :  { %v2413_v61 = vmul.f32 %v6847_v63, %v2410_v39  ;;  %v7273_v63 = vpack.c.bf16 %v8517_v30, %v7899_v17  ;;  %v6259_v17 = vld [vmem:[%s8499_s0 + $0x18] sm:$0xff]  ;;  %v3000_v39 = vadd.f32 1.0, %v8069_v12  ;;  %v3200_v12 = vpop.xlane.xlu0 %3199 }
 0xd35   :  { %v3197_v31 = vmul.f32 %v6259_v17, %v6259_v17 }
 0xd36   :  { %6851 = vmatmul.mubr.msk.f32.vlgmr.msra.gmra.mrb[12].mxu0 %vm119_vm0, %v2413_v61  ;;  %v3003_v61 = vmul.f32 %v8067_v55, %v8067_v55  ;;  %v3006_v34 = vadd.f32 %v3004_v21, %v3000_v39 }
 0xd37   :  { %7264 = vmatpush3.bf16.xpose.msk.msra.mxu0 %vm7720_vm5, %v7259_v60  ;;  %6873 = vmatprep.mubr.msk.f32.mxu0 %vm579_vm4, %v2659_v27  ;;  %v3201_v20 = vsel %vm197_vm2, %v3197_v31, 0.0 }
 0xd38   :  { %6876 = vmatprep.subr.mxu0 %v8133_v59  ;;  %v3005_v57 = vmul.f32 0.5, %v3003_v61 }
 0xd3e   :  { %6874 = vmatmul.mubr.msk.f32.vlgmr.msra.gmra.mrb[26].mxu0 %vm579_vm4, %v2660_v16  ;;  %v3001_v16 = vadd.f32 1.0, %v8067_v55 }
 0xd3f   :  { %6877 = vmatpush3.msra.mxu0 %v8133_v59 }
 0xd40   :  { %7275 = vmatprep.subr.msk.bf16.mxu0 %vm7720_vm5, %v7273_v63 }
 0xe11   :  { %v6875_v28 = vpop.f32.mrb[26].mxu0 }
 0xe12   :  { %v2736_v60 = vpop.f32.mrb[27].mxu0  ;;  %v2746_v62 = vmax.f32 %v6875_v28, 1e-05 }
 0xe13   :  { %v2745_v1 = vmax.f32 %v2736_v60, 1e-05 }
 0xe15   :  { %7462 = vrcp.f32 %v2745_v1  ;;  %v3204_v1 = vmax.f32 %v3200_v12, 1e-24 }
 0xe16   :  { %7464 = vrcp.f32 %v2746_v62 }
 0xe17   :  { %7466 = vrsqrt.f32 %v3204_v1 }
 0xe1f   :  { %v7463_v15 = vpop.eup %7462 }
 0xe20   :  { %2751 = vperm.xlu1 %7432, %v7463_v15   ;;  %v7465_v35 = vpop.eup %7464 }
 0xe24   :  { %2756 = vperm.xlu1 %7432, %v7465_v35  }
 0xe48   :  { %3202 = vadd.xlane.f32.xlu1 %v3201_v20 }
 0xe9f   :  { %v2752_v38 = vpop.permute.xlu1 %2751 }
 0xea0   :  { %v2759_v10 = vmul.f32 %v2752_v38, %v2736_v60  ;;  %v3007_v60 = vadd.f32 %v3005_v57, %v3001_v16 }
 0xea2   :  { %6878 = vmatprep.mubr.msk.f32.mxu0 %vm119_vm0, %v2759_v10 }
 0xea3   :  { %v2757_v29 = vpop.permute.xlu1 %2756 }
 0xea4   :  { %v2760_v27 = vmul.f32 %v6875_v28, %v2757_v29  ;;  %v7467_v28 = vpop.eup %7466 }
 0xea5   :  { %v3208_v35 = vmul.f32 %v7467_v28, %v7768_v33 }
 0xea6   :  { %6879 = vmatmul.mubr.msk.f32.vlgmr.msra.gmra.mrb[12].mxu0 %vm119_vm0, %v2760_v27 }
 0xea7   :  { %7278 = vmatpush3.bf16.xpose.msk.msra.mxu0 %vm7720_vm5, %v7273_v63  ;;  %6901 = vmatprep.mubr.msk.f32.mxu0 %vm579_vm4, %v3006_v34  ;;  %v8165_v63 = vmul.f32 %v7617_v37, %v3208_v35 }
 0xeae   :  { %6902 = vmatmul.mubr.msk.f32.vlgmr.msra.gmra.mrb[28].mxu0 %vm579_vm4, %v3007_v60 }
 0xed5   :  { %v3203_v62 = vpop.xlane.xlu1 %3202 }
 0xed6   :  { %v3205_v15 = vmax.f32 %v3203_v62, 1e-24 }
 0xed8   :  { %7468 = vrsqrt.f32 %v3205_v15 }
 0xee2   :  { %v7469_v31 = vpop.eup %7468 }
 0xee3   :  { %v3209_v20 = vmul.f32 %v7469_v31, %v6259_v17 }
 0xee5   :  { %v8168_v4 = vmul.f32 %v7617_v37, %v3209_v20 }
 0xee7   :  { %v7279_v55 = vpack.c.bf16 %v8168_v4, %v8165_v63 }
 0xee9   :  { %7281 = vmatprep.subr.msk.bf16.mxu1 %vm7625_vm3, %v7279_v55 }
 0xeea   :  { %7284 = vmatpush3.bf16.xpose.msk.msra.mxu1 %vm7625_vm3, %v7279_v55 }
 0xef1   :  { %6914 = vmatmul.mubr.msk.f32.vlgmr.msra.gmra.mrb[38].mxu1 %vm197_vm2, %v7642_v42 }
 0xef2   :  { %6916 = vmatprep.mubr.msk.f32.mxu1 %vm197_vm2, %v7647_v43 }
 0xef5   :  { %6917 = vmatmul.mubr.msk.f32.gmra.mrb[40].mxu1 %vm197_vm2, %v7656_v44 }
 0xef6   :  { %6919 = vmatprep.mubr.msk.f32.mxu1 %vm197_vm2, %v7661_v45 }
 0xef9   :  { %6920 = vmatmul.mubr.msk.f32.gmra.mrb[42].mxu1 %vm197_vm2, %v7670_v46  ;;  %v8209_v46 = vld [vmem:[%s8504_s5 + $0x38] sm:$0xff]  ;;  %s7534_s5 = smov [#allocation2]  }
 0xefa   :  { %6922 = vmatprep.mubr.msk.f32.mxu1 %vm197_vm2, %v7677_v47  ;;  %6904 = vmatprep.subr.mxu0 %v8209_v46  ;;  %s6147_s13 = sshll.u32 %s7534_s5, 4  ;;  %s6148_s13 = int_to_ptr.vmem [resolvable:$true] %s6147_s13 }
 0xefb   :  { %6905 = vmatpush3.msra.mxu0 %v8209_v46  ;;  %s7506_s14 = scalar_lea.vmem %s6148_s13, 512  ;;  %p7511_p1 = scmp.lt.s32.totalorder %s6148_s13, %s6148_s13 }
 0xefc   :  { %7286 = vmatprep.subr.bf16.mxu0 %v7593_v13  ;;  %p7507_p0 = scmp.ne.s32.totalorder %s6148_s13, %s7506_s14  ;;  %p7512_p2 = scmp.lt.s32.totalorder %s7506_s14, %s7506_s14 }
 0xefd   :  { %6923 = vmatmul.mubr.msk.f32.gmra.mrb[44].mxu1 %vm197_vm2, %v7684_v48 }
 0xefe   :  { %6925 = vmatprep.mubr.msk.f32.mxu1 %vm197_vm2, %v7689_v49  ;;  %p7513_p3 = por %p7512_p2, %p7511_p1 }
 0xf00   :  { %p7514_p4 = pnand %p7513_p3, %p7507_p0 }
 0xf01   :  { %6926 = vmatmul.mubr.msk.f32.gmra.mrb[46].mxu1 %vm197_vm2, %v7698_v50 }
 0xf02   :  { %6928 = vmatprep.mubr.msk.f32.mxu1 %vm197_vm2, %v7776_v36 }
 0xf05   :  { %6929 = vmatmul.mubr.msk.f32.gmra.mrb[48].mxu1 %vm197_vm2, %v7781_v41 }
 0xf06   :  { %6931 = vmatprep.mubr.msk.f32.mxu1 %vm197_vm2, %v7786_v51 }
 0xf09   :  { %6932 = vmatmul.mubr.msk.f32.gmra.mrb[50].mxu1 %vm197_vm2, %v7797_v52 }
 0xf0a   :  { %6934 = vmatprep.mubr.msk.f32.mxu1 %vm197_vm2, %v7804_v53 }
 0xf0d   :  { %6935 = vmatmul.mubr.msk.f32.gmra.mrb[52].mxu1 %vm197_vm2, %v7811_v54 }
 0xf81   :  { %v6903_v37 = vpop.f32.mrb[28].mxu0 }
 0xf82   :  { %v3093_v40 = vmax.f32 %v6903_v37, 1e-05  ;;  %v3083_v42 = vpop.f32.mrb[29].mxu0 }
 0xf83   :  { %v3092_v43 = vmax.f32 %v3083_v42, 1e-05 }
 0xf84   :  { %7470 = vrcp.f32 %v3093_v40 }
 0xf85   :  { %7472 = vrcp.f32 %v3092_v43 }
 0xf8e   :  { %v7471_v44 = vpop.eup %7470 }
 0xf8f   :  { %v7473_v45 = vpop.eup %7472  ;;  %3103 = vperm.xlu1 %7432, %v7471_v44  }
 0xf90   :  { %3098 = vperm.xlu0 %7433, %v7473_v45  }
 0xfc4   :  { %v6915_v33 = vpop.f32.mrb[38].mxu1 }
 0xfc5   :  { %v3288_v36 = vpop.f32.mrb[39].mxu1  ;;  %6971 = vmatprep.subr.mxu1 %v6915_v33 }
 0xfc6   :  { %6972 = vmatpush3.msra.mxu1 %v6915_v33 }
 0xfc7   :  { %6983 = vmatprep.subr.mxu1 %v7920_v6 }
 0xfc8   :  { %v8224_v41 = vpop.f32.mrb[40].mxu1 }
0x100e   :  { %v3104_v47 = vpop.permute.xlu1 %3103 }
0x100f   :  { %v3099_v48 = vpop.permute.xlu0 %3098  ;;  %v3107_v50 = vmul.f32 %v6903_v37, %v3104_v47 }
0x1010   :  { %v3106_v49 = vmul.f32 %v3099_v48, %v3083_v42 }
0x1012   :  { %6906 = vmatprep.mubr.msk.f32.mxu0 %vm119_vm0, %v3106_v49 }
0x1013   :  { %6907 = vmatmul.mubr.msk.f32.vlgmr.msra.gmra.mrb[12].mxu0 %vm119_vm0, %v3107_v50 }
0x1014   :  { %7288 = vmatpush3.bf16.msra.mxu0 %v7593_v13  ;;  %6945 = vmatprep.mubr.msk.f32.mxu0 %vm197_vm2, %v8165_v63  ;;  %v8226_v13 = vpop.f32.mrb[41].mxu1 }
0x1015   :  { %7290 = vmatprep.subr.bf16.mxu0 %v7603_v18  ;;  %v8228_v51 = vpop.f32.mrb[42].mxu1 }
0x1016   :  { %v8230_v52 = vpop.f32.mrb[43].mxu1 }
0x1018   :  { %7292 = vmatpush3.bf16.msra.mxu0 %v7603_v18  ;;  %v8232_v18 = vpop.f32.mrb[44].mxu1 }
0x1019   :  { %6948 = vmatprep.subr.mxu0 %v3288_v36  ;;  %v8234_v53 = vpop.f32.mrb[45].mxu1 }
0x101a   :  { %v6927_v54 = vpop.f32.mrb[46].mxu1 }
0x101b   :  { %6946 = vmatmul.mubr.msk.f32.vlgmr.msra.gmra.mrb[30].mxu0 %vm197_vm2, %v8168_v4  ;;  %v3328_v17 = vpop.f32.mrb[47].mxu1  ;;  %v7307_v28 = vpack.c.bf16 %v8517_v30, %v6927_v54 }
0x101c   :  { %6949 = vmatpush3.msra.mxu0 %v3288_v36  ;;  %v7293_v38 = vpack.c.bf16 %v8517_v30, %v3328_v17 }
0x101e   :  { %7295 = vmatprep.subr.msk.bf16.mxu0 %vm7720_vm5, %v7293_v38 }
0x10e6   :  { %v6908_v10 = vpop.f32.mrb[12].mxu0 }
0x10e7   :  { %3192 = vst.msk [vmem:[#allocation2 + $0x8] sm:$0xff] %vm197_vm2, %v6908_v10  ;;  %v3180_v21 = vpop.f32.mrb[13].mxu0 }
0x10e8   :  { %3191 = vst.msk [vmem:[#allocation2] sm:$0xff] %vm197_vm2, %v3180_v21 }
0x10ee   :  { %v6947_v39 = vpop.f32.mrb[30].mxu0 }
0x10ef   :  { %v3433_v29 = vpop.f32.mrb[31].mxu0 }
0x10f0   :  { %6950 = vmatprep.mubr.msk.f32.mxu0 %vm119_vm0, %v3433_v29 }
0x10f1   :  { %6951 = vmatmul.mubr.msk.f32.vlgmr.msra.gmra.mrb[32].mxu0 %vm119_vm0, %v6947_v39 }
0x10f2   :  { %7298 = vmatpush3.bf16.xpose.msk.msra.mxu0 %vm7720_vm5, %v7293_v38 }
0x10f3   :  { %7300 = vmatprep.subr.bf16.mxu0 %v7738_v7 }
0x11c4   :  { %v6952_v61 = vpop.f32.mrb[32].mxu0 }
0x11c5   :  { %v3526_v27 = vmul.f32 %v6952_v61, %v6952_v61  ;;  %v3514_v34 = vpop.f32.mrb[33].mxu0  ;;  %v3524_v1 = vadd.f32 1.0, %v6952_v61 }
0x11c6   :  { %v3525_v57 = vmul.f32 %v3514_v34, %v3514_v34  ;;  %v3523_v60 = vadd.f32 1.0, %v3514_v34 }
0x11c7   :  { %v3528_v16 = vmul.f32 0.5, %v3526_v27 }
0x11c8   :  { %v3527_v12 = vmul.f32 0.5, %v3525_v57 }
0x11c9   :  { %v3530_v15 = vadd.f32 %v3528_v16, %v3524_v1 }
0x11ca   :  { %v3529_v62 = vadd.f32 %v3527_v12, %v3523_v60 }
0x11cc   :  { %6957 = vmatprep.mubr.msk.f32.mxu0 %vm579_vm4, %v3529_v62 }
0x11cd   :  { %6958 = vmatmul.mubr.msk.f32.vlgmr.msra.gmra.mrb[34].mxu0 %vm579_vm4, %v3530_v15 }
0x11ce   :  { %7302 = vmatpush3.bf16.msra.mxu0 %v7738_v7  ;;  %6968 = vmatprep.mubr.msk.f32.mxu0 %vm197_vm2, %v8165_v63  ;;  %v8261_v7 = vpop.f32.mrb[48].mxu1 }
0x11cf   :  { %7304 = vmatprep.subr.bf16.mxu0 %v7747_v25  ;;  %v8263_v35 = vpop.f32.mrb[49].mxu1 }
0x11d0   :  { %v8265_v31 = vpop.f32.mrb[50].mxu1  ;;  %v7321_v62 = vpack.c.bf16 %v8517_v30, %v8263_v35 }
0x11d1   :  { %v8267_v20 = vpop.f32.mrb[51].mxu1 }
0x11d2   :  { %7306 = vmatpush3.bf16.msra.mxu0 %v7747_v25  ;;  %v8269_v25 = vpop.f32.mrb[52].mxu1 }
0x11d3   :  { %7309 = vmatprep.subr.msk.bf16.mxu0 %vm7720_vm5, %v7307_v28  ;;  %v8271_v55 = vpop.f32.mrb[53].mxu1 }
0x11d5   :  { %6969 = vmatmul.mubr.msk.f32.vlgmr.msra.gmra.mrb[36].mxu0 %vm197_vm2, %v8168_v4 }
0x11db   :  { %7312 = vmatpush3.bf16.xpose.msk.msra.mxu0 %vm7720_vm5, %v7307_v28 }
0x11dc   :  { %7314 = vmatprep.subr.bf16.mxu0 %v7821_v3 }
0x12a0   :  { %v8273_v37 = vpop.f32.mrb[34].mxu0 }
0x12a1   :  { %v8275_v40 = vpop.f32.mrb[35].mxu0  ;;  %v3616_v38 = vmax.f32 %v8273_v37, 1e-05 }
0x12a2   :  { %v3615_v10 = vmax.f32 %v8275_v40, 1e-05 }
0x12a8   :  { %v6970_v42 = vpop.f32.mrb[36].mxu0 }
0x12a9   :  { %v3697_v43 = vpop.f32.mrb[37].mxu0 }
0x12aa   :  { %6973 = vmatprep.mubr.msk.f32.mxu1 %vm119_vm0, %v3697_v43 }
0x12ab   :  { %6974 = vmatmul.mubr.msk.f32.vlgmr.msra.gmra.mrb[54].mxu1 %vm119_vm0, %v6970_v42 }
0x12ac   :  { %6984 = vmatpush3.msra.mxu1 %v7920_v6 }
0x12ad   :  { %6988 = vmatprep.subr.mxu1 %v7933_v58 }
0x137e   :  { %v6975_v44 = vpop.f32.mrb[54].mxu1 }
0x137f   :  { %v3790_v45 = vmul.f32 %v6975_v44, %v6975_v44  ;;  %v3778_v47 = vpop.f32.mrb[55].mxu1  ;;  %v3788_v36 = vadd.f32 1.0, %v6975_v44 }
0x1380   :  { %v3789_v48 = vmul.f32 %v3778_v47, %v3778_v47  ;;  %v3787_v50 = vadd.f32 1.0, %v3778_v47 }
0x1381   :  { %v3792_v49 = vmul.f32 0.5, %v3790_v45 }
0x1382   :  { %v3791_v33 = vmul.f32 0.5, %v3789_v48 }
0x1383   :  { %v3794_v17 = vadd.f32 %v3792_v49, %v3788_v36 }
0x1384   :  { %v3793_v54 = vadd.f32 %v3791_v33, %v3787_v50  ;;  %v7335_v50 = vpack.c.bf16 %v8517_v30, %v8261_v7  ;;  %v8520_v7 = vld [vmem:[#allocation6_spill] sm:$0xff] }
0x1386   :  { %6980 = vmatprep.mubr.msk.f32.mxu0 %vm579_vm4, %v3793_v54 }
0x1387   :  { %6981 = vmatmul.mubr.msk.f32.vlgmr.msra.gmra.mrb[38].mxu0 %vm579_vm4, %v3794_v17 }
0x1388   :  { %7316 = vmatpush3.bf16.msra.mxu0 %v7821_v3  ;;  %7001 = vmatprep.mubr.msk.f32.mxu0 %vm197_vm2, %v8165_v63 }
0x1389   :  { %7318 = vmatprep.subr.bf16.mxu0 %v7836_v24 }
0x138c   :  { %7320 = vmatpush3.bf16.msra.mxu0 %v7836_v24 }
0x138d   :  { %7328 = vmatprep.subr.bf16.mxu0 %v7850_v32 }
0x138f   :  { %7002 = vmatmul.mubr.msk.f32.vlgmr.msra.gmra.mrb[40].mxu0 %vm197_vm2, %v8168_v4 }
0x1390   :  { %7330 = vmatpush3.bf16.msra.mxu0 %v7850_v32  ;;  %7029 = vmatprep.mubr.msk.f32.mxu0 %vm197_vm2, %v8165_v63 }
0x1391   :  { %7332 = vmatprep.subr.bf16.mxu0 %v7860_v0 }
0x1394   :  { %7334 = vmatpush3.bf16.msra.mxu0 %v7860_v0 }
0x1395   :  { %7032 = vmatprep.subr.mxu0 %v8224_v41 }
0x1397   :  { %7030 = vmatmul.mubr.msk.f32.vlgmr.msra.gmra.mrb[42].mxu0 %vm197_vm2, %v8168_v4 }
0x1398   :  { %7033 = vmatpush3.msra.mxu0 %v8224_v41 }
0x1399   :  { %7342 = vmatprep.subr.bf16.mxu0 %v7874_v8 }
0x145a   :  { %v6982_v3 = vpop.f32.mrb[38].mxu0 }
0x145b   :  { %v3880_v24 = vmax.f32 %v6982_v3, 1e-05  ;;  %v3870_v6 = vpop.f32.mrb[39].mxu0 }
0x145c   :  { %v3879_v32 = vmax.f32 %v3870_v6, 1e-05 }
0x145d   :  { %7474 = vrcp.f32 %v3880_v24 }
0x145e   :  { %7476 = vrcp.f32 %v3879_v32 }
0x145f   :  { %7478 = vrcp.f32 %v3616_v38 }
0x1460   :  { %7480 = vrcp.f32 %v3615_v10 }
0x1462   :  { %v7003_v0 = vpop.f32.mrb[40].mxu0 }
0x1463   :  { %v4123_v21 = vpop.f32.mrb[41].mxu0 }
0x1467   :  { %v7475_v39 = vpop.eup %7474 }
0x1468   :  { %v7477_v29 = vpop.eup %7476  ;;  %3890 = vperm.xlu1 %7432, %v7475_v39  }
0x1469   :  { %3885 = vperm.xlu0 %7433, %v7477_v29   ;;  %v7479_v61 = vpop.eup %7478 }
0x146a   :  { %v7031_v41 = vpop.f32.mrb[42].mxu0  ;;  %v7481_v34 = vpop.eup %7480 }
0x146b   :  { %v4470_v27 = vpop.f32.mrb[43].mxu0 }
0x146c   :  { %7034 = vmatprep.mubr.msk.f32.mxu0 %vm119_vm0, %v4470_v27  ;;  %3626 = vperm.xlu1 %7432, %v7479_v61  }
0x146d   :  { %7035 = vmatmul.mubr.msk.f32.vlgmr.msra.gmra.mrb[44].mxu0 %vm119_vm0, %v7031_v41  ;;  %3621 = vperm.xlu0 %7433, %v7481_v34   ;;  %v7349_v34 = vpack.c.bf16 %v8517_v30, %v8267_v20 }
0x146e   :  { %7344 = vmatpush3.bf16.msra.mxu0 %v7874_v8  ;;  %7057 = vmatprep.mubr.msk.f32.mxu0 %vm197_vm2, %v8165_v63 }
0x146f   :  { %7346 = vmatprep.subr.bf16.mxu0 %v7878_v11 }
0x1472   :  { %7348 = vmatpush3.bf16.msra.mxu0 %v7878_v11 }
0x1473   :  { %7060 = vmatprep.subr.mxu0 %v8230_v52 }
0x1475   :  { %7058 = vmatmul.mubr.msk.f32.vlgmr.msra.gmra.mrb[46].mxu0 %vm197_vm2, %v8168_v4 }
0x1476   :  { %7061 = vmatpush3.msra.mxu0 %v8230_v52 }
0x1477   :  { %7356 = vmatprep.subr.bf16.mxu0 %v7909_v26 }
0x14e7   :  { %v3891_v57 = vpop.permute.xlu1 %3890 }
0x14e8   :  { %v3886_v16 = vpop.permute.xlu0 %3885  ;;  %v3894_v8 = vmul.f32 %v6982_v3, %v3891_v57 }
0x14e9   :  { %v3893_v60 = vmul.f32 %v3886_v16, %v3870_v6 }
0x14eb   :  { %6985 = vmatprep.mubr.msk.f32.mxu1 %vm119_vm0, %v3893_v60  ;;  %v3627_v1 = vpop.permute.xlu1 %3626 }
0x14ec   :  { %6986 = vmatmul.mubr.msk.f32.vlgmr.msra.gmra.mrb[56].mxu1 %vm119_vm0, %v3894_v8  ;;  %v3622_v12 = vpop.permute.xlu0 %3621  ;;  %v3630_v52 = vmul.f32 %v8273_v37, %v3627_v1 }
0x14ed   :  { %6989 = vmatpush3.msra.mxu1 %v7933_v58  ;;  %v3629_v11 = vmul.f32 %v3622_v12, %v8275_v40 }
0x14ee   :  { %7004 = vmatprep.subr.mxu1 %v8226_v13 }
0x14ef   :  { %6990 = vmatprep.mubr.msk.f32.mxu1 %vm119_vm0, %v3629_v11 }
0x14f4   :  { %6991 = vmatmul.mubr.msk.f32.vlgmr.msra.gmra.mrb[56].mxu1 %vm119_vm0, %v3630_v52 }
0x14f5   :  { %7005 = vmatpush3.msra.mxu1 %v8226_v13  ;;  %7006 = vmatprep.mubr.msk.f32.mxu1 %vm119_vm0, %v4123_v21  ;;  %v8519_v13 = vld [vmem:[#allocation5_spill] sm:$0xff] }
0x14f6   :  { %7323 = vmatprep.subr.msk.bf16.mxu1 %vm7720_vm5, %v7321_v62 }
0x14f8   :  { %7007 = vmatmul.mubr.msk.f32.vlgmr.msra.gmra.mrb[58].mxu1 %vm119_vm0, %v7003_v0 }
0x14fc   :  { %7326 = vmatpush3.bf16.xpose.msk.msra.mxu1 %vm7720_vm5, %v7321_v62 }
0x14fd   :  { %7016 = vmatprep.subr.mxu1 %v7996_v22 }
0x1540   :  { %v8333_v58 = vpop.f32.mrb[44].mxu0 }
0x1541   :  { %v8335_v15 = vpop.f32.mrb[45].mxu0  ;;  %v4563_v41 = vmul.f32 %v8333_v58, %v8333_v58 }
0x1542   :  { %v4560_v29 = vadd.f32 1.0, %v8335_v15 }
0x1548   :  { %v7059_v28 = vpop.f32.mrb[46].mxu0 }
0x1549   :  { %v4817_v35 = vpop.f32.mrb[47].mxu0 }
0x154a   :  { %7062 = vmatprep.mubr.msk.f32.mxu0 %vm119_vm0, %v4817_v35 }
0x154b   :  { %7063 = vmatmul.mubr.msk.f32.vlgmr.msra.gmra.mrb[48].mxu0 %vm119_vm0, %v7059_v28 }
0x154c   :  { %7358 = vmatpush3.bf16.msra.mxu0 %v7909_v26  ;;  %7085 = vmatprep.mubr.msk.f32.mxu0 %vm197_vm2, %v8165_v63 }
0x154d   :  { %7360 = vmatprep.subr.bf16.mxu0 %v8519_v13 }
0x1550   :  { %7362 = vmatpush3.bf16.msra.mxu0 %v8519_v13 }
0x1551   :  { %7088 = vmatprep.subr.mxu0 %v8228_v51 }
0x1553   :  { %7086 = vmatmul.mubr.msk.f32.vlgmr.msra.gmra.mrb[50].mxu0 %vm197_vm2, %v8168_v4 }
0x1554   :  { %7089 = vmatpush3.msra.mxu0 %v8228_v51 }
0x1555   :  { %7370 = vmatprep.subr.bf16.mxu0 %v7955_v23 }
0x15cb   :  { %v7008_v37 = vpop.f32.mrb[58].mxu1 }
0x15cc   :  { %v4216_v40 = vmul.f32 %v7008_v37, %v7008_v37  ;;  %v4204_v42 = vpop.f32.mrb[59].mxu1  ;;  %v4214_v47 = vadd.f32 1.0, %v7008_v37 }
0x15cd   :  { %v4215_v26 = vmul.f32 %v4204_v42, %v4204_v42  ;;  %v4213_v44 = vadd.f32 1.0, %v4204_v42 }
0x15ce   :  { %v4218_v43 = vmul.f32 0.5, %v4216_v40 }
0x15cf   :  { %v4217_v45 = vmul.f32 0.5, %v4215_v26 }
0x15d0   :  { %v4220_v49 = vadd.f32 %v4218_v43, %v4214_v47 }
0x15d1   :  { %v4219_v48 = vadd.f32 %v4217_v45, %v4213_v44  ;;  %v7363_v45 = vpack.c.bf16 %v8517_v30, %v8265_v31 }
0x15d3   :  { %7013 = vmatprep.mubr.msk.f32.mxu1 %vm579_vm4, %v4219_v48 }
0x15d4   :  { %7014 = vmatmul.mubr.msk.f32.vlgmr.msra.gmra.mrb[60].mxu1 %vm579_vm4, %v4220_v49 }
0x15d5   :  { %7017 = vmatpush3.msra.mxu1 %v7996_v22 }
0x15d6   :  { %7337 = vmatprep.subr.msk.bf16.mxu1 %vm7720_vm5, %v7335_v50 }
0x161e   :  { %v8356_v51 = vpop.f32.mrb[48].mxu0 }
0x161f   :  { %v8358_v33 = vpop.f32.mrb[49].mxu0  ;;  %v4910_v37 = vmul.f32 %v8356_v51, %v8356_v51  ;;  %v4908_v43 = vadd.f32 1.0, %v8356_v51 }
0x1620   :  { %v4909_v62 = vmul.f32 %v8358_v33, %v8358_v33  ;;  %v4907_v35 = vadd.f32 1.0, %v8358_v33 }
0x1621   :  { %v4912_v26 = vmul.f32 0.5, %v4910_v37 }
0x1623   :  { %v4914_v44 = vadd.f32 %v4912_v26, %v4908_v43 }
0x1626   :  { %v7087_v36 = vpop.f32.mrb[50].mxu0 }
0x1627   :  { %v5164_v54 = vpop.f32.mrb[51].mxu0 }
0x1628   :  { %7090 = vmatprep.mubr.msk.f32.mxu0 %vm119_vm0, %v5164_v54 }
0x1629   :  { %7091 = vmatmul.mubr.msk.f32.vlgmr.msra.gmra.mrb[52].mxu0 %vm119_vm0, %v7087_v36 }
0x162a   :  { %7372 = vmatpush3.bf16.msra.mxu0 %v7955_v23  ;;  %7113 = vmatprep.mubr.msk.f32.mxu0 %vm197_vm2, %v8165_v63 }
0x162b   :  { %7374 = vmatprep.subr.bf16.mxu0 %v8520_v7 }
0x162e   :  { %7376 = vmatpush3.bf16.msra.mxu0 %v8520_v7 }
0x162f   :  { %7116 = vmatprep.subr.mxu0 %v8234_v53 }
0x1631   :  { %7114 = vmatmul.mubr.msk.f32.vlgmr.msra.gmra.mrb[54].mxu0 %vm197_vm2, %v8168_v4 }
0x1632   :  { %7117 = vmatpush3.msra.mxu0 %v8234_v53  ;;  %v4562_v53 = vmul.f32 %v8335_v15, %v8335_v15 }
0x1633   :  { %7384 = vmatprep.subr.bf16.mxu0 %v8010_v9 }
0x1634   :  { %v4564_v21 = vmul.f32 0.5, %v4562_v53  ;;  %v7377_v53 = vpack.c.bf16 %v8517_v30, %v8271_v55 }
0x1636   :  { %v4566_v61 = vadd.f32 %v4564_v21, %v4560_v29 }
0x16a7   :  { %v7015_v22 = vpop.f32.mrb[60].mxu1 }
0x16a8   :  { %v4306_v17 = vmax.f32 %v7015_v22, 1e-05  ;;  %v4296_v3 = vpop.f32.mrb[61].mxu1 }
0x16a9   :  { %v4305_v23 = vmax.f32 %v4296_v3, 1e-05 }
0x16aa   :  { %7482 = vrcp.f32 %v4306_v17 }
0x16ab   :  { %7484 = vrcp.f32 %v4305_v23 }
0x16b4   :  { %v7483_v24 = vpop.eup %7482 }
0x16b5   :  { %v7485_v6 = vpop.eup %7484  ;;  %4316 = vperm.xlu1 %7432, %v7483_v24  }
0x16b6   :  { %4311 = vperm.xlu0 %7433, %v7485_v6  }
0x16fc   :  { %v8372_v32 = vpop.f32.mrb[52].mxu0 }
0x16fd   :  { %v8374_v38 = vpop.f32.mrb[53].mxu0  ;;  %v5257_v23 = vmul.f32 %v8372_v32, %v8372_v32 }
0x16fe   :  { %v5254_v17 = vadd.f32 1.0, %v8374_v38 }
0x1704   :  { %v7115_v10 = vpop.f32.mrb[54].mxu0 }
0x1705   :  { %v5511_v0 = vpop.f32.mrb[55].mxu0 }
0x1706   :  { %7118 = vmatprep.mubr.msk.f32.mxu0 %vm119_vm0, %v5511_v0 }
0x1707   :  { %7119 = vmatmul.mubr.msk.f32.vlgmr.msra.gmra.mrb[56].mxu0 %vm119_vm0, %v7115_v10  ;;  %v5259_v10 = vmul.f32 0.5, %v5257_v23 }
0x1708   :  { %7386 = vmatpush3.bf16.msra.mxu0 %v8010_v9  ;;  %7141 = vmatprep.mubr.msk.f32.mxu0 %vm197_vm2, %v8165_v63 }
0x1709   :  { %7388 = vmatprep.subr.bf16.mxu0 %v8027_v56 }
0x170c   :  { %7390 = vmatpush3.bf16.msra.mxu0 %v8027_v56 }
0x170d   :  { %7144 = vmatprep.subr.mxu0 %v8232_v18 }
0x170f   :  { %7142 = vmatmul.mubr.msk.f32.vlgmr.msra.gmra.mrb[58].mxu0 %vm197_vm2, %v8168_v4  ;;  %v4565_v4 = vmul.f32 0.5, %v4563_v41 }
0x1710   :  { %7145 = vmatpush3.msra.mxu0 %v8232_v18  ;;  %v4561_v18 = vadd.f32 1.0, %v8333_v58  ;;  %v4911_v58 = vmul.f32 0.5, %v4909_v62 }
0x1712   :  { %v4567_v27 = vadd.f32 %v4565_v4, %v4561_v18  ;;  %v4913_v42 = vadd.f32 %v4911_v58, %v4907_v35 }
0x1734   :  { %v4317_v39 = vpop.permute.xlu1 %4316 }
0x1735   :  { %v4312_v9 = vpop.permute.xlu0 %4311  ;;  %v4320_v56 = vmul.f32 %v7015_v22, %v4317_v39 }
0x1736   :  { %v4319_v63 = vmul.f32 %v4312_v9, %v4296_v3 }
0x1738   :  { %7018 = vmatprep.mubr.msk.f32.mxu1 %vm119_vm0, %v4319_v63 }
0x1739   :  { %7019 = vmatmul.mubr.msk.f32.vlgmr.msra.gmra.mrb[56].mxu1 %vm119_vm0, %v4320_v56 }
0x173a   :  { %7340 = vmatpush3.bf16.xpose.msk.msra.mxu1 %vm7720_vm5, %v7335_v50  ;;  %7041 = vmatprep.mubr.msk.f32.mxu1 %vm579_vm4, %v4566_v61 }
0x173b   :  { %7044 = vmatprep.subr.mxu1 %v8064_v19 }
0x1741   :  { %7042 = vmatmul.mubr.msk.f32.vlgmr.msra.gmra.mrb[62].mxu1 %vm579_vm4, %v4567_v27 }
0x1742   :  { %7045 = vmatpush3.msra.mxu1 %v8064_v19 }
0x1743   :  { %7351 = vmatprep.subr.msk.bf16.mxu1 %vm7720_vm5, %v7349_v34 }
0x17da   :  { %v8405_v57 = vpop.f32.mrb[56].mxu0 }
0x17db   :  { %v8407_v16 = vpop.f32.mrb[57].mxu0  ;;  %v5604_v18 = vmul.f32 %v8405_v57, %v8405_v57 }
0x17dc   :  { %v5603_v55 = vmul.f32 %v8407_v16, %v8407_v16 }
0x17e2   :  { %v7143_v60 = vpop.f32.mrb[58].mxu0 }
0x17e3   :  { %v5858_v8 = vpop.f32.mrb[59].mxu0 }
0x17e4   :  { %7146 = vmatprep.mubr.msk.f32.mxu0 %vm119_vm0, %v5858_v8 }
0x17e5   :  { %7147 = vmatmul.mubr.msk.f32.vlgmr.msra.gmra.mrb[60].mxu0 %vm119_vm0, %v7143_v60  ;;  %v5606_v60 = vmul.f32 0.5, %v5604_v18 }
0x1814   :  { %v7043_v12 = vpop.f32.mrb[62].mxu1 }
0x1815   :  { %v4653_v11 = vmax.f32 %v7043_v12, 1e-05  ;;  %v4643_v20 = vpop.f32.mrb[63].mxu1 }
0x1816   :  { %v4652_v1 = vmax.f32 %v4643_v20, 1e-05 }
0x1817   :  { %7486 = vrcp.f32 %v4653_v11 }
0x1818   :  { %7488 = vrcp.f32 %v4652_v1 }
0x1821   :  { %v7487_v19 = vpop.eup %7486 }
0x1822   :  { %v7489_v52 = vpop.eup %7488  ;;  %4663 = vperm.xlu1 %7432, %v7487_v19  }
0x1823   :  { %4658 = vperm.xlu0 %7433, %v7489_v52  }
0x18a1   :  { %v4664_v15 = vpop.permute.xlu1 %4663 }
0x18a2   :  { %v4659_v28 = vpop.permute.xlu0 %4658  ;;  %v4667_v40 = vmul.f32 %v7043_v12, %v4664_v15  ;;  %v7391_v12 = vpack.c.bf16 %v8517_v30, %v8269_v25 }
0x18a3   :  { %v4666_v13 = vmul.f32 %v4659_v28, %v4643_v20 }
0x18a5   :  { %7046 = vmatprep.mubr.msk.f32.mxu1 %vm119_vm0, %v4666_v13 }
0x18a6   :  { %7047 = vmatmul.mubr.msk.f32.vlgmr.msra.gmra.mrb[56].mxu1 %vm119_vm0, %v4667_v40 }
0x18a7   :  { %7354 = vmatpush3.bf16.xpose.msk.msra.mxu1 %vm7720_vm5, %v7349_v34  ;;  %7069 = vmatprep.mubr.msk.f32.mxu1 %vm579_vm4, %v4913_v42 }
0x18a8   :  { %7072 = vmatprep.subr.mxu1 %v8087_v14 }
0x18ae   :  { %7070 = vmatmul.mubr.msk.f32.vlgmr.msra.gmra.mrb[64].mxu1 %vm579_vm4, %v4914_v44 }
0x18af   :  { %7073 = vmatpush3.msra.mxu1 %v8087_v14  ;;  %v5256_v14 = vmul.f32 %v8374_v38, %v8374_v38  ;;  %v5255_v38 = vadd.f32 1.0, %v8372_v32  ;;  %v5605_v32 = vmul.f32 0.5, %v5603_v55 }
0x18b0   :  { %7365 = vmatprep.subr.msk.bf16.mxu1 %vm7720_vm5, %v7363_v45 }
0x18b1   :  { %v5258_v31 = vmul.f32 0.5, %v5256_v14  ;;  %v5261_v0 = vadd.f32 %v5259_v10, %v5255_v38 }
0x18b3   :  { %v5260_v6 = vadd.f32 %v5258_v31, %v5254_v17 }
0x18b8   :  { %v8429_v47 = vpop.f32.mrb[60].mxu0 }
0x18b9   :  { %v8431_v48 = vpop.f32.mrb[61].mxu0  ;;  %v5951_v28 = vmul.f32 %v8429_v47, %v8429_v47  ;;  %v5949_v40 = vadd.f32 1.0, %v8429_v47 }
0x18ba   :  { %v5950_v30 = vmul.f32 %v8431_v48, %v8431_v48 }
0x18bb   :  { %v5953_v37 = vmul.f32 0.5, %v5951_v28 }
0x18bc   :  { %v5952_v25 = vmul.f32 0.5, %v5950_v30 }
0x18bd   :  { %v5955_v42 = vadd.f32 %v5953_v37, %v5949_v40 }
0x1981   :  { %v7071_v49 = vpop.f32.mrb[64].mxu1 }
0x1982   :  { %v5000_v50 = vmax.f32 %v7071_v49, 1e-05  ;;  %v4990_v33 = vpop.f32.mrb[65].mxu1 }
0x1983   :  { %v4999_v36 = vmax.f32 %v4990_v33, 1e-05 }
0x1984   :  { %7490 = vrcp.f32 %v5000_v50 }
0x1985   :  { %7492 = vrcp.f32 %v4999_v36 }
0x198e   :  { %v7491_v51 = vpop.eup %7490 }
0x198f   :  { %v7493_v54 = vpop.eup %7492  ;;  %5010 = vperm.xlu1 %7432, %v7491_v51  }
0x1990   :  { %5005 = vperm.xlu0 %7433, %v7493_v54  }
0x1a0e   :  { %v5011_v7 = vpop.permute.xlu1 %5010 }
0x1a0f   :  { %v5006_v22 = vpop.permute.xlu0 %5005  ;;  %v5014_v24 = vmul.f32 %v7071_v49, %v5011_v7 }
0x1a10   :  { %v5013_v3 = vmul.f32 %v5006_v22, %v4990_v33 }
0x1a12   :  { %7074 = vmatprep.mubr.msk.f32.mxu1 %vm119_vm0, %v5013_v3 }
0x1a13   :  { %7075 = vmatmul.mubr.msk.f32.vlgmr.msra.gmra.mrb[56].mxu1 %vm119_vm0, %v5014_v24 }
0x1a14   :  { %7368 = vmatpush3.bf16.xpose.msk.msra.mxu1 %vm7720_vm5, %v7363_v45  ;;  %7097 = vmatprep.mubr.msk.f32.mxu1 %vm579_vm4, %v5260_v6 }
0x1a15   :  { %7100 = vmatprep.subr.mxu1 %v8110_v5 }
0x1a1b   :  { %7098 = vmatmul.mubr.msk.f32.vlgmr.msra.gmra.mrb[66].mxu1 %vm579_vm4, %v5261_v0 }
0x1a1c   :  { %7101 = vmatpush3.msra.mxu1 %v8110_v5  ;;  %v5601_v5 = vadd.f32 1.0, %v8407_v16  ;;  %v5602_v16 = vadd.f32 1.0, %v8405_v57 }
0x1a1d   :  { %7379 = vmatprep.subr.msk.bf16.mxu1 %vm7720_vm5, %v7377_v53 }
0x1a1e   :  { %v5607_v34 = vadd.f32 %v5605_v32, %v5601_v5  ;;  %v5608_v8 = vadd.f32 %v5606_v60, %v5602_v16 }
0x1aee   :  { %v7099_v21 = vpop.f32.mrb[66].mxu1 }
0x1aef   :  { %v5347_v39 = vmax.f32 %v7099_v21, 1e-05  ;;  %v5337_v9 = vpop.f32.mrb[67].mxu1 }
0x1af0   :  { %v5346_v29 = vmax.f32 %v5337_v9, 1e-05 }
0x1af1   :  { %7494 = vrcp.f32 %v5347_v39 }
0x1af2   :  { %7496 = vrcp.f32 %v5346_v29 }
0x1afb   :  { %v7495_v63 = vpop.eup %7494 }
0x1afc   :  { %v7497_v41 = vpop.eup %7496  ;;  %5357 = vperm.xlu1 %7432, %v7495_v63  }
0x1afd   :  { %5352 = vperm.xlu0 %7433, %v7497_v41  }
0x1b7b   :  { %v5358_v56 = vpop.permute.xlu1 %5357 }
0x1b7c   :  { %v5353_v61 = vpop.permute.xlu0 %5352  ;;  %v5361_v27 = vmul.f32 %v7099_v21, %v5358_v56 }
0x1b7d   :  { %v5360_v4 = vmul.f32 %v5353_v61, %v5337_v9 }
0x1b7f   :  { %7102 = vmatprep.mubr.msk.f32.mxu1 %vm119_vm0, %v5360_v4 }
0x1b80   :  { %7103 = vmatmul.mubr.msk.f32.vlgmr.msra.gmra.mrb[56].mxu1 %vm119_vm0, %v5361_v27 }
0x1b81   :  { %7382 = vmatpush3.bf16.xpose.msk.msra.mxu1 %vm7720_vm5, %v7377_v53  ;;  %7125 = vmatprep.mubr.msk.f32.mxu1 %vm579_vm4, %v5607_v34 }
0x1b82   :  { %7128 = vmatprep.subr.mxu1 %v8133_v59 }
0x1b88   :  { %7126 = vmatmul.mubr.msk.f32.vlgmr.msra.gmra.mrb[68].mxu1 %vm579_vm4, %v5608_v8 }
0x1b89   :  { %7129 = vmatpush3.msra.mxu1 %v8133_v59  ;;  %v5948_v59 = vadd.f32 1.0, %v8431_v48 }
0x1b8a   :  { %7393 = vmatprep.subr.msk.bf16.mxu1 %vm7720_vm5, %v7391_v12 }
0x1b8b   :  { %v5954_v13 = vadd.f32 %v5952_v25, %v5948_v59 }
0x1c5b   :  { %v7127_v11 = vpop.f32.mrb[68].mxu1 }
0x1c5c   :  { %v5694_v20 = vmax.f32 %v7127_v11, 1e-05  ;;  %v5684_v1 = vpop.f32.mrb[69].mxu1 }
0x1c5d   :  { %v5693_v19 = vmax.f32 %v5684_v1, 1e-05 }
0x1c5e   :  { %7498 = vrcp.f32 %v5694_v20 }
0x1c5f   :  { %7500 = vrcp.f32 %v5693_v19 }
0x1c68   :  { %v7499_v52 = vpop.eup %7498 }
0x1c69   :  { %v7501_v62 = vpop.eup %7500  ;;  %5704 = vperm.xlu1 %7432, %v7499_v52  }
0x1c6a   :  { %5699 = vperm.xlu0 %7433, %v7501_v62  }
0x1ce8   :  { %v5705_v57 = vpop.permute.xlu1 %5704 }
0x1ce9   :  { %v5700_v58 = vpop.permute.xlu0 %5699  ;;  %v5708_v35 = vmul.f32 %v7127_v11, %v5705_v57 }
0x1cea   :  { %v5707_v15 = vmul.f32 %v5700_v58, %v5684_v1 }
0x1cec   :  { %7130 = vmatprep.mubr.msk.f32.mxu1 %vm119_vm0, %v5707_v15 }
0x1ced   :  { %7131 = vmatmul.mubr.msk.f32.vlgmr.msra.gmra.mrb[56].mxu1 %vm119_vm0, %v5708_v35 }
0x1cee   :  { %7396 = vmatpush3.bf16.xpose.msk.msra.mxu1 %vm7720_vm5, %v7391_v12  ;;  %7153 = vmatprep.mubr.msk.f32.mxu1 %vm579_vm4, %v5954_v13 }
0x1cef   :  { %7156 = vmatprep.subr.mxu1 %v8209_v46 }
0x1cf5   :  { %7154 = vmatmul.mubr.msk.f32.vlgmr.msra.gmra.mrb[70].mxu1 %vm579_vm4, %v5955_v42 }
0x1cf6   :  { %7157 = vmatpush3.msra.mxu1 %v8209_v46 }
0x1dc8   :  { %v7155_v26 = vpop.f32.mrb[70].mxu1 }
0x1dc9   :  { %v6041_v43 = vmax.f32 %v7155_v26, 1e-05  ;;  %v6031_v44 = vpop.f32.mrb[71].mxu1 }
0x1dca   :  { %v6040_v45 = vmax.f32 %v6031_v44, 1e-05 }
0x1dcb   :  { %7502 = vrcp.f32 %v6041_v43 }
0x1dcc   :  { %7504 = vrcp.f32 %v6040_v45 }
0x1dd5   :  { %v7503_v2 = vpop.eup %7502 }
0x1dd6   :  { %v7505_v48 = vpop.eup %7504  ;;  %6051 = vperm.xlu1 %7432, %v7503_v2  }
0x1dd7   :  { %6046 = vperm.xlu0 %7433, %v7505_v48  }
0x1e55   :  { %v6052_v49 = vpop.permute.xlu1 %6051 }
0x1e56   :  { %v6047_v50 = vpop.permute.xlu0 %6046  ;;  %v6055_v36 = vmul.f32 %v7155_v26, %v6052_v49 }
0x1e57   :  { %v6054_v33 = vmul.f32 %v6047_v50, %v6031_v44 }
0x1e59   :  { %7158 = vmatprep.mubr.msk.f32.mxu1 %vm119_vm0, %v6054_v33 }
0x1e5a   :  { %7159 = vmatmul.mubr.msk.f32.vlgmr.msra.gmra.mrb[56].mxu1 %vm119_vm0, %v6055_v36 }
0x1f2d   :  { %v7160_v46 = vpop.f32.mrb[56].mxu1 }
0x1f2e   :  { %6141 = vst.msk [vmem:[#allocation2 + $0x18] sm:$0xff] %vm197_vm2, %v7160_v46  ;;  %v6128_v47 = vpop.f32.mrb[57].mxu1 }
0x1f2f   :  { %6140 = vst.msk [vmem:[#allocation2 + $0x10] sm:$0xff] %vm197_vm2, %v6128_v47 }
0x1f30   :  { %7517 = shalt.err (!%p7514_p4)
}
0x1f31   :  { %s7518_s16 = scalar_lea.hbm %s8505_s6, 512 }
0x1f32   :  { %p7519_p5 = scmp.ne.s32.totalorder %s8505_s6, %s7518_s16  ;;  %p7522_p6 = scmp.lt.u32.totalorder %s7518_s16, %s8505_s6 }
0x1f34   :  { %p7524_p7 = pnand %p7522_p6, %p7519_p5 }
0x1f36   :  { %7527 = shalt.err (!%p7524_p7)
}
0x1f37   :  { %s7535_s21 = smov 128   ;;  %s7536_s22 = smov 8  }
0x1f38   :  { %6153 = dma.vmem_to_hbm [thread:$0]  %s6148_s13, 512, %s8505_s6, [#allocation3], %s7535_s21, %s7535_s21, %s7536_s22  }
0x1f39   :  { %7528 = dma.done.wait [#allocation3], 512  }
0x1f3a   :  { %7529 = vsyncadd [#allocation3], 4294966784 }
0x1f3b   :  { %6157 = vsyncpa [#allocation3], 1 }

</bundles_post_ra>
